<compile_context>
chip_gen: v7x
topology: tpu7x:2x2x1
jax: 0.10.0
libtpu: 0.0.40
codegen_flags: <defaults>
</compile_context>

<pallas_src>
import functools

import jax
import jax.numpy as jnp
import numpy as np
from jax.experimental import pallas as pl
from jax.experimental.pallas import tpu as pltpu

# ---------------------------------------------------------------------------
# Static model geometry (shared_fc input = 68 = 16*2*2 + 4)
# ---------------------------------------------------------------------------
OBS = 5            # 5x5 single-channel observation
C1, C2 = 8, 16     # conv channel counts
N_EXTRA = 4        # width of x_2
N_ACTIONS = 5      # TODO(synk): env.action_space.n unknown from snippet; assumed 5.
N_HIDDEN = 128
HEAD_PAD = 8       # actor logits (5) + critic (1) padded to 8 lanes
BN_EPS = 1e-5


def _conv_out_size(n, k, s, p):
    return (n + 2 * p - k) // s + 1


def _conv_taps(n_in, k, s, p):
    """Per output spatial index (row-major): list of (s_in, tap) with in-bounds input."""
    n_out = _conv_out_size(n_in, k, s, p)
    taps = []
    for oh in range(n_out):
        for ow in range(n_out):
            lst = []
            for kh in range(k):
                ih = oh * s - p + kh
                if not (0 <= ih < n_in):
                    continue
                for kw in range(k):
                    iw = ow * s - p + kw
                    if not (0 <= iw < n_in):
                        continue
                    lst.append((ih * n_in + iw, kh * k + kw))
            taps.append(lst)
    return n_out, taps


def _pool_windows(n_in, k, s, p):
    """Per pool output position (row-major): list of valid input spatial indices."""
    n_out = _conv_out_size(n_in, k, s, p)
    wins = []
    for oh in range(n_out):
        for ow in range(n_out):
            idx = []
            for dh in range(k):
                ih = oh * s - p + dh
                if not (0 <= ih < n_in):
                    continue
                for dw in range(k):
                    iw = ow * s - p + dw
                    if not (0 <= iw < n_in):
                        continue
                    idx.append(ih * n_in + iw)
            wins.append(idx)
    return n_out, wins


S1, CONV1_TAPS = _conv_taps(OBS, 3, 2, 3)    # conv1: 5x5 -> 5x5
P1, POOL1_WIN = _pool_windows(S1, 3, 2, 1)   # pool1: 5x5 -> 3x3
S2, CONV2_TAPS = _conv_taps(P1, 3, 2, 3)     # conv2: 3x3 -> 4x4
P2, POOL2_WIN = _pool_windows(S2, 3, 2, 1)   # pool2: 4x4 -> 2x2
N_FLAT = C2 * P2 * P2                        # 64
N_FEAT = N_FLAT + N_EXTRA                    # 68  (matches nn.Linear(68, 128))
assert N_FEAT == 68

N_COLS1 = S1 * S1 * C1                       # 200 packed conv1 columns
N_COLS2 = S2 * S2 * C2                       # 256 packed conv2 columns
_AUX_SMALL = C1 + C2                         # row where small vectors start in aux


# ---------------------------------------------------------------------------
# The fused Pallas kernel
# ---------------------------------------------------------------------------
def _actor_critic_kernel(x_ref, w1_ref, w2_ref, wfc1_ref, wfc2h_ref,
                         sel1_ref, sel2_ref, aux_ref, out_ref):
    f32 = jnp.float32
    bf16 = jnp.bfloat16
    B = x_ref.shape[0]

    x1 = x_ref[:, 0:OBS * OBS]                                  # (B, 25)
    x2 = x_ref[:, OBS * OBS:OBS * OBS + N_EXTRA]                # (B, 4)

    # Small params / selector transposes (single packed aux operand).
    sel1T = aux_ref[0:C1, 0:N_COLS1]                            # (8, 200)
    sel2T = aux_ref[C1:C1 + C2, 0:N_COLS2]                      # (16, 256)
    g1 = aux_ref[_AUX_SMALL + 0:_AUX_SMALL + 1, 0:C1]
    b1 = aux_ref[_AUX_SMALL + 1:_AUX_SMALL + 2, 0:C1]
    g2 = aux_ref[_AUX_SMALL + 2:_AUX_SMALL + 3, 0:C2]
    b2 = aux_ref[_AUX_SMALL + 3:_AUX_SMALL + 4, 0:C2]
    fc1_b = aux_ref[_AUX_SMALL + 4:_AUX_SMALL + 5, 0:N_HIDDEN]
    fc2_b = aux_ref[_AUX_SMALL + 5:_AUX_SMALL + 6, 0:N_HIDDEN]
    head_b = aux_ref[_AUX_SMALL + 6:_AUX_SMALL + 7, 0:HEAD_PAD]

    def packed_bn_relu(y, sel, selT, gamma, beta, n_spatial):
        """Training-mode BatchNorm2d + ReLU on a packed (B, n_spatial*C) tensor
        whose columns are ordered (spatial, channel). All math in f32."""
        cnt = float(B * n_spatial)
        colsum = jnp.sum(y, axis=0, keepdims=True)                      # (1, S*C)
        colsq = jnp.sum(y * y, axis=0, keepdims=True)                   # (1, S*C)
        s = jnp.dot(colsum, sel, preferred_element_type=f32)            # (1, C)
        ss = jnp.dot(colsq, sel, preferred_element_type=f32)            # (1, C)
        mean = s / cnt
        var = jnp.maximum(ss / cnt - mean * mean, 0.0)                  # biased var
        scale = jax.lax.rsqrt(var + BN_EPS) * gamma                     # (1, C)
        shift = beta - mean * scale                                     # (1, C)
        scale_p = jnp.dot(scale, selT, preferred_element_type=f32)      # (1, S*C)
        shift_p = jnp.dot(shift, selT, preferred_element_type=f32)      # (1, S*C)
        return jnp.maximum(y * scale_p + shift_p, 0.0)

    def max_over(blocks, idxs):
        return functools.reduce(jnp.maximum, [blocks[i] for i in idxs])

    # ---- conv1: single MXU matmul against the precomputed effective weight.
    y1 = jnp.dot(x1.astype(bf16), w1_ref[...], preferred_element_type=f32)  # (B, 200)
    y1n = packed_bn_relu(y1, sel1_ref[...], sel1T, g1, b1, S1 * S1)

    # ---- maxpool1: static lane slices of the VMEM-resident packed tensor.
    blocks1 = [y1n[:, C1 * s:C1 * (s + 1)] for s in range(S1 * S1)]     # 25 x (B, 8)
    pool1 = [max_over(blocks1, win) for win in POOL1_WIN]               # 9 x (B, 8)
    pool1_packed = jnp.concatenate(pool1, axis=1)                       # (B, 72)

    # ---- conv2: one effective matmul on the packed pool1 slab.
    y2 = jnp.dot(pool1_packed.astype(bf16), w2_ref[...],
                 preferred_element_type=f32)                            # (B, 256)
    y2n = packed_bn_relu(y2, sel2_ref[...], sel2T, g2, b2, S2 * S2)

    # ---- maxpool2
    blocks2 = [y2n[:, C2 * s:C2 * (s + 1)] for s in range(S2 * S2)]     # 16 x (B, 16)
    pool2 = [max_over(blocks2, win) for win in POOL2_WIN]               # 4 x (B, 16)

    # ---- shared_fc layer 1: one fused matmul over [pool2 | x2] (B, 68).
    feat = jnp.concatenate(pool2 + [x2], axis=1)                        # (B, 68)
    h = jnp.tanh(jnp.dot(feat.astype(bf16), wfc1_ref[...],
                         preferred_element_type=f32) + fc1_b)

    # ---- shared_fc layer 2
    h = jnp.tanh(jnp.dot(h.astype(bf16), wfc2h_ref[:, 0:N_HIDDEN],
                         preferred_element_type=f32) + fc2_b)

    # ---- fused actor + critic head (padded to 8 lanes -> aligned store).
    z = jnp.dot(h.astype(bf16), wfc2h_ref[:, N_HIDDEN:N_HIDDEN + HEAD_PAD],
                preferred_element_type=f32) + head_b                    # (B, 8)
    col = jax.lax.broadcasted_iota(jnp.int32, z.shape, 1)
    is_actor = col < N_ACTIONS
    logits = jnp.where(is_actor, z, -jnp.inf)
    m = jnp.max(logits, axis=-1, keepdims=True)
    e = jnp.exp(logits - m)                                             # pad cols -> 0
    probs = e / jnp.sum(e, axis=-1, keepdims=True)                      # exact divide
    out_ref[...] = probs + jnp.where(col == N_ACTIONS, z, 0.0)


# ---------------------------------------------------------------------------
# pallas_call wrapper (single fused kernel invocation, full-array blocks)
# ---------------------------------------------------------------------------
def _full_spec(shape):
    nd = len(shape)
    return pl.BlockSpec(shape, lambda *_, nd=nd: (0,) * nd)


def actor_critic_forward(params, x1_nchw, x2):
    B = x1_nchw.shape[0]
    # Cin == 1, so an NCHW reshape is exactly the torch row-major (h*5 + w) order.
    x = jnp.concatenate(
        [x1_nchw.reshape(B, OBS * OBS).astype(jnp.float32),
         x2.astype(jnp.float32)], axis=1)                               # (B, 29)

    operands = (x, params["w1_eff"], params["w2_eff"], params["w_fc1"],
                params["w_fc2h"], params["sel1"], params["sel2"], params["aux"])

    out = pl.pallas_call(
        _actor_critic_kernel,
        out_shape=jax.ShapeDtypeStruct((B, HEAD_PAD), jnp.float32),
        grid=(1,),
        in_specs=[_full_spec(op.shape) for op in operands],
        out_specs=_full_spec((B, HEAD_PAD)),
        compiler_params=pltpu.CompilerParams(
            dimension_semantics=("arbitrary",)),
    )(*operands)

    return out[:, :N_ACTIONS], out[:, N_ACTIONS:N_ACTIONS + 1]


# ---------------------------------------------------------------------------
# Parameters: PyTorch-layout init, then one-time repack into kernel layout
# ---------------------------------------------------------------------------
def init_torch_params(key):
    ks = jax.random.split(key, 12)

    def unif(k, shape, fan_in):
        bound = 1.0 / float(np.sqrt(fan_in))
        return jax.random.uniform(k, shape, jnp.float32, -bound, bound)

    return {
        "conv1.w": unif(ks[0], (C1, 1, 3, 3), 9),
        "conv1.b": unif(ks[1], (C1,), 9),
        "bn1.gamma": jnp.ones((C1,), jnp.float32),
        "bn1.beta": jnp.zeros((C1,), jnp.float32),
        "conv2.w": unif(ks[2], (C2, C1, 3, 3), C1 * 9),
        "conv2.b": unif(ks[3], (C2,), C1 * 9),
        "bn2.gamma": jnp.ones((C2,), jnp.float32),
        "bn2.beta": jnp.zeros((C2,), jnp.float32),
        "fc1.w": unif(ks[4], (N_HIDDEN, N_FEAT), N_FEAT),
        "fc1.b": unif(ks[5], (N_HIDDEN,), N_FEAT),
        "fc2.w": unif(ks[6], (N_HIDDEN, N_HIDDEN), N_HIDDEN),
        "fc2.b": unif(ks[7], (N_HIDDEN,), N_HIDDEN),
        "actor.w": unif(ks[8], (N_ACTIONS, N_HIDDEN), N_HIDDEN),
        "actor.b": unif(ks[9], (N_ACTIONS,), N_HIDDEN),
        "critic.w": unif(ks[10], (1, N_HIDDEN), N_HIDDEN),
        "critic.b": unif(ks[11], (1,), N_HIDDEN),
    }


def prepare_params(tp):
    """One-time repack of PyTorch-layout parameters into kernel layout."""
    # conv1 -> effective dense matmul: (25 input pixels) -> (25 positions x 8 ch).
    w1 = np.asarray(tp["conv1.w"], np.float32).reshape(C1, 9)       # (cout, kh*3+kw)
    w1_eff = np.zeros((OBS * OBS, N_COLS1), np.float32)
    for s_out, taps in enumerate(CONV1_TAPS):
        for (s_in, t) in taps:
            w1_eff[s_in, s_out * C1:(s_out + 1) * C1] += w1[:, t]

    # conv2 -> effective dense matmul: (9 pool1 pos x 8 cin) -> (16 pos x 16 cout).
    w2 = np.asarray(tp["conv2.w"], np.float32).reshape(C2, C1, 9)
    w2_eff = np.zeros((P1 * P1 * C1, N_COLS2), np.float32)
    for s_out, taps in enumerate(CONV2_TAPS):
        for (s_in, t) in taps:
            for cin in range(C1):
                w2_eff[s_in * C1 + cin, s_out * C2:(s_out + 1) * C2] += w2[:, cin, t]

    # fc1: (out,in) -> (in,out); conv rows permuted from torch.flatten order
    # (c*4 + s) into the kernel's concat order (s*16 + c); x2 rows appended.
    wf1 = np.asarray(tp["fc1.w"], np.float32).T                     # (68, 128)
    w_fc1 = np.zeros((N_FEAT, N_HIDDEN), np.float32)
    for s in range(P2 * P2):
        for c in range(C2):
            w_fc1[s * C2 + c, :] = wf1[c * (P2 * P2) + s, :]
    w_fc1[N_FLAT:N_FEAT, :] = wf1[N_FLAT:N_FEAT, :]

    # fc2 and the padded (actor|critic) head packed side-by-side: (128, 136).
    w_fc2 = np.asarray(tp["fc2.w"], np.float32).T                   # (128, 128)
    w_head = np.zeros((N_HIDDEN, HEAD_PAD), np.float32)
    w_head[:, :N_ACTIONS] = np.asarray(tp["actor.w"], np.float32).T
    w_head[:, N_ACTIONS:N_ACTIONS + 1] = np.asarray(tp["critic.w"], np.float32).T
    w_fc2h = np.concatenate([w_fc2, w_head], axis=1)                # (128, 136)

    # 0/1 channel selectors for packed BN (columns ordered (spatial, channel)).
    def selector(n_spatial, n_ch):
        sel = np.zeros((n_spatial * n_ch, n_ch), np.float32)
        for s in range(n_spatial):
            for c in range(n_ch):
                sel[s * n_ch + c, c] = 1.0
        return sel

    sel1 = selector(S1 * S1, C1)                                    # (200, 8)
    sel2 = selector(S2 * S2, C2)                                    # (256, 16)

    # Single f32 aux blob: selector transposes + all small vectors.
    aux = np.zeros((32, 256), np.float32)
    aux[0:C1, 0:N_COLS1] = sel1.T
    aux[C1:C1 + C2, 0:N_COLS2] = sel2.T
    aux[_AUX_SMALL + 0, 0:C1] = np.asarray(tp["bn1.gamma"], np.float32)
    aux[_AUX_SMALL + 1, 0:C1] = np.asarray(tp["bn1.beta"], np.float32)
    aux[_AUX_SMALL + 2, 0:C2] = np.asarray(tp["bn2.gamma"], np.float32)
    aux[_AUX_SMALL + 3, 0:C2] = np.asarray(tp["bn2.beta"], np.float32)
    aux[_AUX_SMALL + 4, 0:N_HIDDEN] = np.asarray(tp["fc1.b"], np.float32)
    aux[_AUX_SMALL + 5, 0:N_HIDDEN] = np.asarray(tp["fc2.b"], np.float32)
    aux[_AUX_SMALL + 6, 0:N_ACTIONS] = np.asarray(tp["actor.b"], np.float32)
    aux[_AUX_SMALL + 6, N_ACTIONS] = np.asarray(tp["critic.b"], np.float32)[0]

    return {
        "w1_eff": jnp.asarray(w1_eff, jnp.bfloat16),   # MXU operands in bf16
        "w2_eff": jnp.asarray(w2_eff, jnp.bfloat16),
        "w_fc1": jnp.asarray(w_fc1, jnp.bfloat16),
        "w_fc2h": jnp.asarray(w_fc2h, jnp.bfloat16),
        "sel1": jnp.asarray(sel1),                     # BN stats stay f32
        "sel2": jnp.asarray(sel2),
        "aux": jnp.asarray(aux),
    }


# ---------------------------------------------------------------------------
if __name__ == "__main__":
    key = jax.random.PRNGKey(0)
    k_x1, k_x2, k_p = jax.random.split(key, 3)

    B = 8  # num_agents=8 in the env; BN batch stats require the whole batch in one block.
    x_1 = jax.random.normal(k_x1, (B, 1, OBS, OBS), jnp.float32)   # NCHW observation
    x_2 = jax.random.normal(k_x2, (B, N_EXTRA), jnp.float32)       # extra features

    params = prepare_params(init_torch_params(k_p))

    fwd = jax.jit(lambda a, b: actor_critic_forward(params, a, b))
    probs, value = fwd(x_1, x_2)
    jax.block_until_ready((probs, value))

    assert probs.shape == (B, N_ACTIONS)
    assert value.shape == (B, 1)
    assert bool(jnp.all(jnp.isfinite(probs))) and bool(jnp.all(jnp.isfinite(value)))
    assert bool(jnp.all(probs >= 0.0))
    assert bool(jnp.allclose(jnp.sum(probs, axis=-1), 1.0, atol=1e-4))
    print("KERNEL_OK")
</pallas_src>

<mosaic_0001>
module attributes {stable_mosaic.version = 11 : i64} {
  func.func @_actor_critic_kernel(%arg0: i32, %arg1: memref<8x29xf32, #tpu.memory_space<vmem>>, %arg2: memref<25x200xbf16, #tpu.memory_space<vmem>>, %arg3: memref<72x256xbf16, #tpu.memory_space<vmem>>, %arg4: memref<68x128xbf16, #tpu.memory_space<vmem>>, %arg5: memref<128x136xbf16, #tpu.memory_space<vmem>>, %arg6: memref<200x8xf32, #tpu.memory_space<vmem>>, %arg7: memref<256x16xf32, #tpu.memory_space<vmem>>, %arg8: memref<32x256xf32, #tpu.memory_space<vmem>>, %arg9: memref<8x8xf32, #tpu.memory_space<vmem>>) attributes {dimension_semantics = [#tpu.dimension_semantics<arbitrary>], iteration_bounds = array<i64: 1>, scalar_prefetch = 0 : i64, scratch_operands = 0 : i64, tpu.core_type = #tpu.core_type<tc>, window_params = [{pipeline_mode = #tpu.pipeline_mode<synchronous>, transform_indices = @transform_0, window_bounds = array<i64: 8, 29>}, {pipeline_mode = #tpu.pipeline_mode<synchronous>, transform_indices = @transform_1, window_bounds = array<i64: 25, 200>}, {pipeline_mode = #tpu.pipeline_mode<synchronous>, transform_indices = @transform_2, window_bounds = array<i64: 72, 256>}, {pipeline_mode = #tpu.pipeline_mode<synchronous>, transform_indices = @transform_3, window_bounds = array<i64: 68, 128>}, {pipeline_mode = #tpu.pipeline_mode<synchronous>, transform_indices = @transform_4, window_bounds = array<i64: 128, 136>}, {pipeline_mode = #tpu.pipeline_mode<synchronous>, transform_indices = @transform_5, window_bounds = array<i64: 200, 8>}, {pipeline_mode = #tpu.pipeline_mode<synchronous>, transform_indices = @transform_6, window_bounds = array<i64: 256, 16>}, {pipeline_mode = #tpu.pipeline_mode<synchronous>, transform_indices = @transform_7, window_bounds = array<i64: 32, 256>}, {pipeline_mode = #tpu.pipeline_mode<synchronous>, transform_indices = @transform_8, window_bounds = array<i64: 8, 8>}]} {
    %c0 = arith.constant 0 : index
    %c0_0 = arith.constant 0 : index
    %0 = vector.load %arg1[%c0, %c0_0] : memref<8x29xf32, #tpu.memory_space<vmem>>, vector<8x25xf32>
    %c0_1 = arith.constant 0 : index
    %c25 = arith.constant 25 : index
    %1 = vector.load %arg1[%c0_1, %c25] : memref<8x29xf32, #tpu.memory_space<vmem>>, vector<8x4xf32>
    %c0_2 = arith.constant 0 : index
    %c0_3 = arith.constant 0 : index
    %2 = vector.load %arg8[%c0_2, %c0_3] : memref<32x256xf32, #tpu.memory_space<vmem>>, vector<8x200xf32>
    %c8 = arith.constant 8 : index
    %c0_4 = arith.constant 0 : index
    %3 = vector.load %arg8[%c8, %c0_4] : memref<32x256xf32, #tpu.memory_space<vmem>>, vector<16x256xf32>
    %c24 = arith.constant 24 : index
    %c0_5 = arith.constant 0 : index
    %4 = vector.load %arg8[%c24, %c0_5] : memref<32x256xf32, #tpu.memory_space<vmem>>, vector<1x8xf32>
    %c25_6 = arith.constant 25 : index
    %c0_7 = arith.constant 0 : index
    %5 = vector.load %arg8[%c25_6, %c0_7] : memref<32x256xf32, #tpu.memory_space<vmem>>, vector<1x8xf32>
    %c26 = arith.constant 26 : index
    %c0_8 = arith.constant 0 : index
    %6 = vector.load %arg8[%c26, %c0_8] : memref<32x256xf32, #tpu.memory_space<vmem>>, vector<1x16xf32>
    %c27 = arith.constant 27 : index
    %c0_9 = arith.constant 0 : index
    %7 = vector.load %arg8[%c27, %c0_9] : memref<32x256xf32, #tpu.memory_space<vmem>>, vector<1x16xf32>
    %c28 = arith.constant 28 : index
    %c0_10 = arith.constant 0 : index
    %8 = vector.load %arg8[%c28, %c0_10] : memref<32x256xf32, #tpu.memory_space<vmem>>, vector<1x128xf32>
    %c29 = arith.constant 29 : index
    %c0_11 = arith.constant 0 : index
    %9 = vector.load %arg8[%c29, %c0_11] : memref<32x256xf32, #tpu.memory_space<vmem>>, vector<1x128xf32>
    %c30 = arith.constant 30 : index
    %c0_12 = arith.constant 0 : index
    %10 = vector.load %arg8[%c30, %c0_12] : memref<32x256xf32, #tpu.memory_space<vmem>>, vector<1x8xf32>
    %11 = arith.truncf %0 : vector<8x25xf32> to vector<8x25xbf16>
    %c0_13 = arith.constant 0 : index
    %c0_14 = arith.constant 0 : index
    %12 = vector.load %arg2[%c0_13, %c0_14] : memref<25x200xbf16, #tpu.memory_space<vmem>>, vector<25x200xbf16>
    %cst = arith.constant dense<0.000000e+00> : vector<8x200xf32>
    %13 = tpu.matmul %11, %12, %cst {dimension_numbers = #tpu.dot_dimension_numbers<[1], [0], [0], [1], [0, 0, 1, 1], [], []>} : vector<8x25xbf16>, vector<25x200xbf16>, vector<8x200xf32> -> vector<8x200xf32>
    %c0_15 = arith.constant 0 : index
    %c0_16 = arith.constant 0 : index
    %14 = vector.load %arg6[%c0_15, %c0_16] : memref<200x8xf32, #tpu.memory_space<vmem>>, vector<200x8xf32>
    %cst_17 = arith.constant dense<0.000000e+00> : vector<200xf32>
    %15 = vector.multi_reduction <add>, %13, %cst_17 [0] : vector<8x200xf32> to vector<200xf32>
    %16 = vector.shape_cast %15 : vector<200xf32> to vector<1x200xf32>
    %17 = arith.mulf %13, %13 : vector<8x200xf32>
    %cst_18 = arith.constant dense<0.000000e+00> : vector<200xf32>
    %18 = vector.multi_reduction <add>, %17, %cst_18 [0] : vector<8x200xf32> to vector<200xf32>
    %19 = vector.shape_cast %18 : vector<200xf32> to vector<1x200xf32>
    %cst_19 = arith.constant dense<0.000000e+00> : vector<1x8xf32>
    %20 = tpu.matmul %16, %14, %cst_19 {dimension_numbers = #tpu.dot_dimension_numbers<[1], [0], [0], [1], [0, 0, 1, 1], [], []>} : vector<1x200xf32>, vector<200x8xf32>, vector<1x8xf32> -> vector<1x8xf32>
    %cst_20 = arith.constant dense<0.000000e+00> : vector<1x8xf32>
    %21 = tpu.matmul %19, %14, %cst_20 {dimension_numbers = #tpu.dot_dimension_numbers<[1], [0], [0], [1], [0, 0, 1, 1], [], []>} : vector<1x200xf32>, vector<200x8xf32>, vector<1x8xf32> -> vector<1x8xf32>
    %cst_21 = arith.constant 2.000000e+02 : f32
    %22 = vector.broadcast %cst_21 : f32 to vector<1x8xf32>
    %23 = arith.divf %20, %22 : vector<1x8xf32>
    %cst_22 = arith.constant 2.000000e+02 : f32
    %24 = vector.broadcast %cst_22 : f32 to vector<1x8xf32>
    %25 = arith.divf %21, %24 : vector<1x8xf32>
    %26 = arith.mulf %23, %23 : vector<1x8xf32>
    %27 = arith.subf %25, %26 : vector<1x8xf32>
    %cst_23 = arith.constant 0.000000e+00 : f32
    %28 = vector.broadcast %cst_23 : f32 to vector<1x8xf32>
    %29 = arith.maximumf %27, %28 : vector<1x8xf32>
    %cst_24 = arith.constant 9.99999974E-6 : f32
    %30 = vector.broadcast %cst_24 : f32 to vector<1x8xf32>
    %31 = arith.addf %29, %30 : vector<1x8xf32>
    %32 = math.rsqrt %31 : vector<1x8xf32>
    %33 = arith.mulf %32, %4 : vector<1x8xf32>
    %34 = arith.mulf %23, %33 : vector<1x8xf32>
    %35 = arith.subf %5, %34 : vector<1x8xf32>
    %cst_25 = arith.constant dense<0.000000e+00> : vector<1x200xf32>
    %36 = tpu.matmul %33, %2, %cst_25 {dimension_numbers = #tpu.dot_dimension_numbers<[1], [0], [0], [1], [0, 0, 1, 1], [], []>} : vector<1x8xf32>, vector<8x200xf32>, vector<1x200xf32> -> vector<1x200xf32>
    %cst_26 = arith.constant dense<0.000000e+00> : vector<1x200xf32>
    %37 = tpu.matmul %35, %2, %cst_26 {dimension_numbers = #tpu.dot_dimension_numbers<[1], [0], [0], [1], [0, 0, 1, 1], [], []>} : vector<1x8xf32>, vector<8x200xf32>, vector<1x200xf32> -> vector<1x200xf32>
    %38 = vector.broadcast %36 : vector<1x200xf32> to vector<8x200xf32>
    %39 = arith.mulf %13, %38 : vector<8x200xf32>
    %40 = vector.broadcast %37 : vector<1x200xf32> to vector<8x200xf32>
    %41 = arith.addf %39, %40 : vector<8x200xf32>
    %cst_27 = arith.constant 0.000000e+00 : f32
    %42 = vector.broadcast %cst_27 : f32 to vector<8x200xf32>
    %43 = arith.maximumf %41, %42 : vector<8x200xf32>
    %44 = vector.extract_strided_slice %43 {offsets = [0, 0], sizes = [8, 8], strides = [1, 1]} : vector<8x200xf32> to vector<8x8xf32>
    %45 = vector.extract_strided_slice %43 {offsets = [0, 8], sizes = [8, 8], strides = [1, 1]} : vector<8x200xf32> to vector<8x8xf32>
    %46 = vector.extract_strided_slice %43 {offsets = [0, 16], sizes = [8, 8], strides = [1, 1]} : vector<8x200xf32> to vector<8x8xf32>
    %47 = vector.extract_strided_slice %43 {offsets = [0, 24], sizes = [8, 8], strides = [1, 1]} : vector<8x200xf32> to vector<8x8xf32>
    %48 = vector.extract_strided_slice %43 {offsets = [0, 32], sizes = [8, 8], strides = [1, 1]} : vector<8x200xf32> to vector<8x8xf32>
    %49 = vector.extract_strided_slice %43 {offsets = [0, 40], sizes = [8, 8], strides = [1, 1]} : vector<8x200xf32> to vector<8x8xf32>
    %50 = vector.extract_strided_slice %43 {offsets = [0, 48], sizes = [8, 8], strides = [1, 1]} : vector<8x200xf32> to vector<8x8xf32>
    %51 = vector.extract_strided_slice %43 {offsets = [0, 56], sizes = [8, 8], strides = [1, 1]} : vector<8x200xf32> to vector<8x8xf32>
    %52 = vector.extract_strided_slice %43 {offsets = [0, 64], sizes = [8, 8], strides = [1, 1]} : vector<8x200xf32> to vector<8x8xf32>
    %53 = vector.extract_strided_slice %43 {offsets = [0, 72], sizes = [8, 8], strides = [1, 1]} : vector<8x200xf32> to vector<8x8xf32>
    %54 = vector.extract_strided_slice %43 {offsets = [0, 80], sizes = [8, 8], strides = [1, 1]} : vector<8x200xf32> to vector<8x8xf32>
    %55 = vector.extract_strided_slice %43 {offsets = [0, 88], sizes = [8, 8], strides = [1, 1]} : vector<8x200xf32> to vector<8x8xf32>
    %56 = vector.extract_strided_slice %43 {offsets = [0, 96], sizes = [8, 8], strides = [1, 1]} : vector<8x200xf32> to vector<8x8xf32>
    %57 = vector.extract_strided_slice %43 {offsets = [0, 104], sizes = [8, 8], strides = [1, 1]} : vector<8x200xf32> to vector<8x8xf32>
    %58 = vector.extract_strided_slice %43 {offsets = [0, 112], sizes = [8, 8], strides = [1, 1]} : vector<8x200xf32> to vector<8x8xf32>
    %59 = vector.extract_strided_slice %43 {offsets = [0, 120], sizes = [8, 8], strides = [1, 1]} : vector<8x200xf32> to vector<8x8xf32>
    %60 = vector.extract_strided_slice %43 {offsets = [0, 128], sizes = [8, 8], strides = [1, 1]} : vector<8x200xf32> to vector<8x8xf32>
    %61 = vector.extract_strided_slice %43 {offsets = [0, 136], sizes = [8, 8], strides = [1, 1]} : vector<8x200xf32> to vector<8x8xf32>
    %62 = vector.extract_strided_slice %43 {offsets = [0, 144], sizes = [8, 8], strides = [1, 1]} : vector<8x200xf32> to vector<8x8xf32>
    %63 = vector.extract_strided_slice %43 {offsets = [0, 152], sizes = [8, 8], strides = [1, 1]} : vector<8x200xf32> to vector<8x8xf32>
    %64 = vector.extract_strided_slice %43 {offsets = [0, 160], sizes = [8, 8], strides = [1, 1]} : vector<8x200xf32> to vector<8x8xf32>
    %65 = vector.extract_strided_slice %43 {offsets = [0, 168], sizes = [8, 8], strides = [1, 1]} : vector<8x200xf32> to vector<8x8xf32>
    %66 = vector.extract_strided_slice %43 {offsets = [0, 176], sizes = [8, 8], strides = [1, 1]} : vector<8x200xf32> to vector<8x8xf32>
    %67 = vector.extract_strided_slice %43 {offsets = [0, 184], sizes = [8, 8], strides = [1, 1]} : vector<8x200xf32> to vector<8x8xf32>
    %68 = vector.extract_strided_slice %43 {offsets = [0, 192], sizes = [8, 8], strides = [1, 1]} : vector<8x200xf32> to vector<8x8xf32>
    %69 = arith.maximumf %44, %45 : vector<8x8xf32>
    %70 = arith.maximumf %69, %49 : vector<8x8xf32>
    %71 = arith.maximumf %70, %50 : vector<8x8xf32>
    %72 = arith.maximumf %45, %46 : vector<8x8xf32>
    %73 = arith.maximumf %72, %47 : vector<8x8xf32>
    %74 = arith.maximumf %73, %50 : vector<8x8xf32>
    %75 = arith.maximumf %74, %51 : vector<8x8xf32>
    %76 = arith.maximumf %75, %52 : vector<8x8xf32>
    %77 = arith.maximumf %47, %48 : vector<8x8xf32>
    %78 = arith.maximumf %77, %52 : vector<8x8xf32>
    %79 = arith.maximumf %78, %53 : vector<8x8xf32>
    %80 = arith.maximumf %49, %50 : vector<8x8xf32>
    %81 = arith.maximumf %80, %54 : vector<8x8xf32>
    %82 = arith.maximumf %81, %55 : vector<8x8xf32>
    %83 = arith.maximumf %82, %59 : vector<8x8xf32>
    %84 = arith.maximumf %83, %60 : vector<8x8xf32>
    %85 = arith.maximumf %50, %51 : vector<8x8xf32>
    %86 = arith.maximumf %85, %52 : vector<8x8xf32>
    %87 = arith.maximumf %86, %55 : vector<8x8xf32>
    %88 = arith.maximumf %87, %56 : vector<8x8xf32>
    %89 = arith.maximumf %88, %57 : vector<8x8xf32>
    %90 = arith.maximumf %89, %60 : vector<8x8xf32>
    %91 = arith.maximumf %90, %61 : vector<8x8xf32>
    %92 = arith.maximumf %91, %62 : vector<8x8xf32>
    %93 = arith.maximumf %52, %53 : vector<8x8xf32>
    %94 = arith.maximumf %93, %57 : vector<8x8xf32>
    %95 = arith.maximumf %94, %58 : vector<8x8xf32>
    %96 = arith.maximumf %95, %62 : vector<8x8xf32>
    %97 = arith.maximumf %96, %63 : vector<8x8xf32>
    %98 = arith.maximumf %59, %60 : vector<8x8xf32>
    %99 = arith.maximumf %98, %64 : vector<8x8xf32>
    %100 = arith.maximumf %99, %65 : vector<8x8xf32>
    %101 = arith.maximumf %60, %61 : vector<8x8xf32>
    %102 = arith.maximumf %101, %62 : vector<8x8xf32>
    %103 = arith.maximumf %102, %65 : vector<8x8xf32>
    %104 = arith.maximumf %103, %66 : vector<8x8xf32>
    %105 = arith.maximumf %104, %67 : vector<8x8xf32>
    %106 = arith.maximumf %62, %63 : vector<8x8xf32>
    %107 = arith.maximumf %106, %67 : vector<8x8xf32>
    %108 = arith.maximumf %107, %68 : vector<8x8xf32>
    %109 = tpu.concatenate %71, %76, %79, %84, %92, %97, %100, %105, %108 in 1 : vector<8x8xf32>, vector<8x8xf32>, vector<8x8xf32>, vector<8x8xf32>, vector<8x8xf32>, vector<8x8xf32>, vector<8x8xf32>, vector<8x8xf32>, vector<8x8xf32> -> vector<8x72xf32>
    %110 = arith.truncf %109 : vector<8x72xf32> to vector<8x72xbf16>
    %c0_28 = arith.constant 0 : index
    %c0_29 = arith.constant 0 : index
    %111 = vector.load %arg3[%c0_28, %c0_29] : memref<72x256xbf16, #tpu.memory_space<vmem>>, vector<72x256xbf16>
    %cst_30 = arith.constant dense<0.000000e+00> : vector<8x256xf32>
    %112 = tpu.matmul %110, %111, %cst_30 {dimension_numbers = #tpu.dot_dimension_numbers<[1], [0], [0], [1], [0, 0, 1, 1], [], []>} : vector<8x72xbf16>, vector<72x256xbf16>, vector<8x256xf32> -> vector<8x256xf32>
    %c0_31 = arith.constant 0 : index
    %c0_32 = arith.constant 0 : index
    %113 = vector.load %arg7[%c0_31, %c0_32] : memref<256x16xf32, #tpu.memory_space<vmem>>, vector<256x16xf32>
    %cst_33 = arith.constant dense<0.000000e+00> : vector<256xf32>
    %114 = vector.multi_reduction <add>, %112, %cst_33 [0] : vector<8x256xf32> to vector<256xf32>
    %115 = vector.shape_cast %114 : vector<256xf32> to vector<1x256xf32>
    %116 = arith.mulf %112, %112 : vector<8x256xf32>
    %cst_34 = arith.constant dense<0.000000e+00> : vector<256xf32>
    %117 = vector.multi_reduction <add>, %116, %cst_34 [0] : vector<8x256xf32> to vector<256xf32>
    %118 = vector.shape_cast %117 : vector<256xf32> to vector<1x256xf32>
    %cst_35 = arith.constant dense<0.000000e+00> : vector<1x16xf32>
    %119 = tpu.matmul %115, %113, %cst_35 {dimension_numbers = #tpu.dot_dimension_numbers<[1], [0], [0], [1], [0, 0, 1, 1], [], []>} : vector<1x256xf32>, vector<256x16xf32>, vector<1x16xf32> -> vector<1x16xf32>
    %cst_36 = arith.constant dense<0.000000e+00> : vector<1x16xf32>
    %120 = tpu.matmul %118, %113, %cst_36 {dimension_numbers = #tpu.dot_dimension_numbers<[1], [0], [0], [1], [0, 0, 1, 1], [], []>} : vector<1x256xf32>, vector<256x16xf32>, vector<1x16xf32> -> vector<1x16xf32>
    %cst_37 = arith.constant 1.280000e+02 : f32
    %121 = vector.broadcast %cst_37 : f32 to vector<1x16xf32>
    %122 = arith.divf %119, %121 : vector<1x16xf32>
    %cst_38 = arith.constant 1.280000e+02 : f32
    %123 = vector.broadcast %cst_38 : f32 to vector<1x16xf32>
    %124 = arith.divf %120, %123 : vector<1x16xf32>
    %125 = arith.mulf %122, %122 : vector<1x16xf32>
    %126 = arith.subf %124, %125 : vector<1x16xf32>
    %cst_39 = arith.constant 0.000000e+00 : f32
    %127 = vector.broadcast %cst_39 : f32 to vector<1x16xf32>
    %128 = arith.maximumf %126, %127 : vector<1x16xf32>
    %cst_40 = arith.constant 9.99999974E-6 : f32
    %129 = vector.broadcast %cst_40 : f32 to vector<1x16xf32>
    %130 = arith.addf %128, %129 : vector<1x16xf32>
    %131 = math.rsqrt %130 : vector<1x16xf32>
    %132 = arith.mulf %131, %6 : vector<1x16xf32>
    %133 = arith.mulf %122, %132 : vector<1x16xf32>
    %134 = arith.subf %7, %133 : vector<1x16xf32>
    %cst_41 = arith.constant dense<0.000000e+00> : vector<1x256xf32>
    %135 = tpu.matmul %132, %3, %cst_41 {dimension_numbers = #tpu.dot_dimension_numbers<[1], [0], [0], [1], [0, 0, 1, 1], [], []>} : vector<1x16xf32>, vector<16x256xf32>, vector<1x256xf32> -> vector<1x256xf32>
    %cst_42 = arith.constant dense<0.000000e+00> : vector<1x256xf32>
    %136 = tpu.matmul %134, %3, %cst_42 {dimension_numbers = #tpu.dot_dimension_numbers<[1], [0], [0], [1], [0, 0, 1, 1], [], []>} : vector<1x16xf32>, vector<16x256xf32>, vector<1x256xf32> -> vector<1x256xf32>
    %137 = vector.broadcast %135 : vector<1x256xf32> to vector<8x256xf32>
    %138 = arith.mulf %112, %137 : vector<8x256xf32>
    %139 = vector.broadcast %136 : vector<1x256xf32> to vector<8x256xf32>
    %140 = arith.addf %138, %139 : vector<8x256xf32>
    %cst_43 = arith.constant 0.000000e+00 : f32
    %141 = vector.broadcast %cst_43 : f32 to vector<8x256xf32>
    %142 = arith.maximumf %140, %141 : vector<8x256xf32>
    %143 = vector.extract_strided_slice %142 {offsets = [0, 0], sizes = [8, 16], strides = [1, 1]} : vector<8x256xf32> to vector<8x16xf32>
    %144 = vector.extract_strided_slice %142 {offsets = [0, 16], sizes = [8, 16], strides = [1, 1]} : vector<8x256xf32> to vector<8x16xf32>
    %145 = vector.extract_strided_slice %142 {offsets = [0, 32], sizes = [8, 16], strides = [1, 1]} : vector<8x256xf32> to vector<8x16xf32>
    %146 = vector.extract_strided_slice %142 {offsets = [0, 48], sizes = [8, 16], strides = [1, 1]} : vector<8x256xf32> to vector<8x16xf32>
    %147 = vector.extract_strided_slice %142 {offsets = [0, 64], sizes = [8, 16], strides = [1, 1]} : vector<8x256xf32> to vector<8x16xf32>
    %148 = vector.extract_strided_slice %142 {offsets = [0, 80], sizes = [8, 16], strides = [1, 1]} : vector<8x256xf32> to vector<8x16xf32>
    %149 = vector.extract_strided_slice %142 {offsets = [0, 96], sizes = [8, 16], strides = [1, 1]} : vector<8x256xf32> to vector<8x16xf32>
    %150 = vector.extract_strided_slice %142 {offsets = [0, 112], sizes = [8, 16], strides = [1, 1]} : vector<8x256xf32> to vector<8x16xf32>
    %151 = vector.extract_strided_slice %142 {offsets = [0, 128], sizes = [8, 16], strides = [1, 1]} : vector<8x256xf32> to vector<8x16xf32>
    %152 = vector.extract_strided_slice %142 {offsets = [0, 144], sizes = [8, 16], strides = [1, 1]} : vector<8x256xf32> to vector<8x16xf32>
    %153 = vector.extract_strided_slice %142 {offsets = [0, 160], sizes = [8, 16], strides = [1, 1]} : vector<8x256xf32> to vector<8x16xf32>
    %154 = vector.extract_strided_slice %142 {offsets = [0, 176], sizes = [8, 16], strides = [1, 1]} : vector<8x256xf32> to vector<8x16xf32>
    %155 = vector.extract_strided_slice %142 {offsets = [0, 192], sizes = [8, 16], strides = [1, 1]} : vector<8x256xf32> to vector<8x16xf32>
    %156 = vector.extract_strided_slice %142 {offsets = [0, 208], sizes = [8, 16], strides = [1, 1]} : vector<8x256xf32> to vector<8x16xf32>
    %157 = vector.extract_strided_slice %142 {offsets = [0, 224], sizes = [8, 16], strides = [1, 1]} : vector<8x256xf32> to vector<8x16xf32>
    %158 = vector.extract_strided_slice %142 {offsets = [0, 240], sizes = [8, 16], strides = [1, 1]} : vector<8x256xf32> to vector<8x16xf32>
    %159 = arith.maximumf %143, %144 : vector<8x16xf32>
    %160 = arith.maximumf %159, %147 : vector<8x16xf32>
    %161 = arith.maximumf %160, %148 : vector<8x16xf32>
    %162 = arith.maximumf %144, %145 : vector<8x16xf32>
    %163 = arith.maximumf %162, %146 : vector<8x16xf32>
    %164 = arith.maximumf %163, %148 : vector<8x16xf32>
    %165 = arith.maximumf %164, %149 : vector<8x16xf32>
    %166 = arith.maximumf %165, %150 : vector<8x16xf32>
    %167 = arith.maximumf %147, %148 : vector<8x16xf32>
    %168 = arith.maximumf %167, %151 : vector<8x16xf32>
    %169 = arith.maximumf %168, %152 : vector<8x16xf32>
    %170 = arith.maximumf %169, %155 : vector<8x16xf32>
    %171 = arith.maximumf %170, %156 : vector<8x16xf32>
    %172 = arith.maximumf %148, %149 : vector<8x16xf32>
    %173 = arith.maximumf %172, %150 : vector<8x16xf32>
    %174 = arith.maximumf %173, %152 : vector<8x16xf32>
    %175 = arith.maximumf %174, %153 : vector<8x16xf32>
    %176 = arith.maximumf %175, %154 : vector<8x16xf32>
    %177 = arith.maximumf %176, %156 : vector<8x16xf32>
    %178 = arith.maximumf %177, %157 : vector<8x16xf32>
    %179 = arith.maximumf %178, %158 : vector<8x16xf32>
    %180 = tpu.concatenate %161, %166, %171, %179, %1 in 1 : vector<8x16xf32>, vector<8x16xf32>, vector<8x16xf32>, vector<8x16xf32>, vector<8x4xf32> -> vector<8x68xf32>
    %181 = arith.truncf %180 : vector<8x68xf32> to vector<8x68xbf16>
    %c0_44 = arith.constant 0 : index
    %c0_45 = arith.constant 0 : index
    %182 = vector.load %arg4[%c0_44, %c0_45] : memref<68x128xbf16, #tpu.memory_space<vmem>>, vector<68x128xbf16>
    %cst_46 = arith.constant dense<0.000000e+00> : vector<8x128xf32>
    %183 = tpu.matmul %181, %182, %cst_46 {dimension_numbers = #tpu.dot_dimension_numbers<[1], [0], [0], [1], [0, 0, 1, 1], [], []>} : vector<8x68xbf16>, vector<68x128xbf16>, vector<8x128xf32> -> vector<8x128xf32>
    %184 = vector.broadcast %8 : vector<1x128xf32> to vector<8x128xf32>
    %185 = arith.addf %183, %184 : vector<8x128xf32>
    %186 = math.tanh %185 : vector<8x128xf32>
    %187 = arith.truncf %186 : vector<8x128xf32> to vector<8x128xbf16>
    %c0_47 = arith.constant 0 : index
    %c0_48 = arith.constant 0 : index
    %188 = vector.load %arg5[%c0_47, %c0_48] : memref<128x136xbf16, #tpu.memory_space<vmem>>, vector<128x128xbf16>
    %cst_49 = arith.constant dense<0.000000e+00> : vector<8x128xf32>
    %189 = tpu.matmul %187, %188, %cst_49 {dimension_numbers = #tpu.dot_dimension_numbers<[1], [0], [0], [1], [0, 0, 1, 1], [], []>} : vector<8x128xbf16>, vector<128x128xbf16>, vector<8x128xf32> -> vector<8x128xf32>
    %190 = vector.broadcast %9 : vector<1x128xf32> to vector<8x128xf32>
    %191 = arith.addf %189, %190 : vector<8x128xf32>
    %192 = math.tanh %191 : vector<8x128xf32>
    %193 = arith.truncf %192 : vector<8x128xf32> to vector<8x128xbf16>
    %c0_50 = arith.constant 0 : index
    %c128 = arith.constant 128 : index
    %194 = vector.load %arg5[%c0_50, %c128] : memref<128x136xbf16, #tpu.memory_space<vmem>>, vector<128x8xbf16>
    %cst_51 = arith.constant dense<0.000000e+00> : vector<8x8xf32>
    %195 = tpu.matmul %193, %194, %cst_51 {dimension_numbers = #tpu.dot_dimension_numbers<[1], [0], [0], [1], [0, 0, 1, 1], [], []>} : vector<8x128xbf16>, vector<128x8xbf16>, vector<8x8xf32> -> vector<8x8xf32>
    %196 = vector.broadcast %10 : vector<1x8xf32> to vector<8x8xf32>
    %197 = arith.addf %195, %196 : vector<8x8xf32>
    %198 = tpu.iota {dimensions = array<i32: 1>} : vector<8x8xi32>
    %c5_i32 = arith.constant 5 : i32
    %199 = vector.broadcast %c5_i32 : i32 to vector<8x8xi32>
    %200 = arith.cmpi slt, %198, %199 : vector<8x8xi32>
    %cst_52 = arith.constant 0xFF800000 : f32
    %201 = vector.broadcast %cst_52 : f32 to vector<8x8xf32>
    %202 = arith.select %200, %197, %201 : vector<8x8xi1>, vector<8x8xf32>
    %cst_53 = arith.constant dense<0xFF800000> : vector<8xf32>
    %203 = vector.multi_reduction <maximumf>, %202, %cst_53 [1] : vector<8x8xf32> to vector<8xf32>
    %204 = vector.shape_cast %203 : vector<8xf32> to vector<8x1xf32>
    %205 = vector.broadcast %204 : vector<8x1xf32> to vector<8x8xf32>
    %206 = arith.subf %202, %205 : vector<8x8xf32>
    %207 = math.exp %206 : vector<8x8xf32>
    %cst_54 = arith.constant dense<0.000000e+00> : vector<8xf32>
    %208 = vector.multi_reduction <add>, %207, %cst_54 [1] : vector<8x8xf32> to vector<8xf32>
    %209 = vector.shape_cast %208 : vector<8xf32> to vector<8x1xf32>
    %210 = vector.broadcast %209 : vector<8x1xf32> to vector<8x8xf32>
    %211 = arith.divf %207, %210 : vector<8x8xf32>
    %c5_i32_55 = arith.constant 5 : i32
    %212 = vector.broadcast %c5_i32_55 : i32 to vector<8x8xi32>
    %213 = arith.cmpi eq, %198, %212 : vector<8x8xi32>
    %cst_56 = arith.constant 0.000000e+00 : f32
    %214 = vector.broadcast %cst_56 : f32 to vector<8x8xf32>
    %215 = arith.select %213, %197, %214 : vector<8x8xi1>, vector<8x8xf32>
    %216 = arith.addf %211, %215 : vector<8x8xf32>
    %c0_57 = arith.constant 0 : index
    %c0_58 = arith.constant 0 : index
    %217 = vector.load %arg9[%c0_57, %c0_58] : memref<8x8xf32, #tpu.memory_space<vmem>>, vector<8x8xf32>
    tpu.vector_store %arg9[%c0_57, %c0_58], %216 {strides = array<i32>} : memref<8x8xf32, #tpu.memory_space<vmem>>, vector<8x8xf32>,
    return
  }
  func.func @transform_0(%arg0: i32) -> (i32, i32) {
    %c0_i32 = arith.constant 0 : i32
    %c0_i32_0 = arith.constant 0 : i32
    %c0_i32_1 = arith.constant 0 : i32
    return %c0_i32, %c0_i32_0 : i32, i32
  }
  func.func @transform_1(%arg0: i32) -> (i32, i32) {
    %c0_i32 = arith.constant 0 : i32
    %c0_i32_0 = arith.constant 0 : i32
    %c0_i32_1 = arith.constant 0 : i32
    return %c0_i32, %c0_i32_0 : i32, i32
  }
  func.func @transform_2(%arg0: i32) -> (i32, i32) {
    %c0_i32 = arith.constant 0 : i32
    %c0_i32_0 = arith.constant 0 : i32
    %c0_i32_1 = arith.constant 0 : i32
    return %c0_i32, %c0_i32_0 : i32, i32
  }
  func.func @transform_3(%arg0: i32) -> (i32, i32) {
    %c0_i32 = arith.constant 0 : i32
    %c0_i32_0 = arith.constant 0 : i32
    %c0_i32_1 = arith.constant 0 : i32
    return %c0_i32, %c0_i32_0 : i32, i32
  }
  func.func @transform_4(%arg0: i32) -> (i32, i32) {
    %c0_i32 = arith.constant 0 : i32
    %c0_i32_0 = arith.constant 0 : i32
    %c0_i32_1 = arith.constant 0 : i32
    return %c0_i32, %c0_i32_0 : i32, i32
  }
  func.func @transform_5(%arg0: i32) -> (i32, i32) {
    %c0_i32 = arith.constant 0 : i32
    %c0_i32_0 = arith.constant 0 : i32
    %c0_i32_1 = arith.constant 0 : i32
    return %c0_i32, %c0_i32_0 : i32, i32
  }
  func.func @transform_6(%arg0: i32) -> (i32, i32) {
    %c0_i32 = arith.constant 0 : i32
    %c0_i32_0 = arith.constant 0 : i32
    %c0_i32_1 = arith.constant 0 : i32
    return %c0_i32, %c0_i32_0 : i32, i32
  }
  func.func @transform_7(%arg0: i32) -> (i32, i32) {
    %c0_i32 = arith.constant 0 : i32
    %c0_i32_0 = arith.constant 0 : i32
    %c0_i32_1 = arith.constant 0 : i32
    return %c0_i32, %c0_i32_0 : i32, i32
  }
  func.func @transform_8(%arg0: i32) -> (i32, i32) {
    %c0_i32 = arith.constant 0 : i32
    %c0_i32_0 = arith.constant 0 : i32
    %c0_i32_1 = arith.constant 0 : i32
    return %c0_i32, %c0_i32_0 : i32, i32
  }
}

</mosaic_0001>

<bundles_post_ra>
// kernel: _lambda_.1
= control target key start
LH: loop header
LB: loop body
LE: loop exit
PB: predicated region body
PF: predicated region fallthrough
CT: control target
= control target key end

     0   :  { %13 = vsyncpa [#allocation3], 0  ;;  %s2546_s0 = inlined_call_operand.vmem [shape: f32[8,29], index: 0, kind: input, shape index: {}]   ;;  %s2547_s1 = inlined_call_operand.hbm [shape: bf16[25,200], index: 1, kind: input, shape index: {}]   ;;  %s2548_s2 = inlined_call_operand.hbm [shape: bf16[72,256], index: 2, kind: input, shape index: {}]   ;;  %s2549_s3 = inlined_call_operand.vmem [shape: bf16[68,128], index: 3, kind: input, shape index: {}]   ;;  %s2550_s4 = inlined_call_operand.vmem [shape: bf16[128,136], index: 4, kind: input, shape index: {}]   ;;  %s2551_s5 = inlined_call_operand.vmem [shape: f32[200,8], index: 5, kind: input, shape index: {}]   ;;  %s2552_s6 = inlined_call_operand.vmem [shape: f32[256,16], index: 6, kind: input, shape index: {}]   ;;  %s2553_s7 = inlined_call_operand.hbm [shape: f32[32,256], index: 7, kind: input, shape index: {}]   ;;  %s2554_s8 = inlined_call_operand.vmem [shape: f32[8,8], index: 8, kind: output, shape index: {}]  }
   0x1   :  { %14 = vsyncpa [#allocation5], 0  ;;  %s2038_s27 = smov [#allocation4]   ;;  %s2039_s29 = smov [#allocation2]  }
   0x2   :  { %s34_s28 = sshll.u32 %s2038_s27, 4  ;;  %s22_s30 = sshll.u32 %s2039_s29, 4  ;;  %s35_s28 = int_to_ptr.vmem [resolvable:$true] %s34_s28  ;;  %s2108_s30 = int_to_ptr.vmem [resolvable:$true] %s22_s30 }
   0x3   :  { %s1968_s11 = scalar_lea.hbm %s2548_s2, 1152 }
   0x4   :  { %p1969_p0 = scmp.ne.s32.totalorder %s2548_s2, %s1968_s11  ;;  %p1972_p1 = scmp.lt.u32.totalorder %s1968_s11, %s2548_s2 }
   0x6   :  { %p1974_p2 = pnand %p1972_p1, %p1969_p0 }
   0x8   :  { %1977 = shalt.err (!%p1974_p2)
}
   0x9   :  { %s1978_s16 = scalar_lea.vmem %s35_s28, 1152  ;;  %p1983_p4 = scmp.lt.s32.totalorder %s35_s28, %s35_s28 }
   0xa   :  { %p1979_p3 = scmp.ne.s32.totalorder %s35_s28, %s1978_s16  ;;  %p1984_p5 = scmp.lt.s32.totalorder %s1978_s16, %s1978_s16 }
   0xc   :  { %p1985_p6 = por %p1984_p5, %p1983_p4 }
   0xe   :  { %p1986_p7 = pnand %p1985_p6, %p1979_p3 }
  0x10   :  { %1989 = shalt.err (!%p1986_p7)
}
  0x11   :  { %s2040_s17 = smov 128   ;;  %s2041_s18 = smov 8  }
  0x12   :  { %40 = dma.hbm_to_vmem [thread:$0]  %s2548_s2, 1152, %s35_s28, [#allocation5], %s2040_s17, %s2040_s17, %s2041_s18  }
  0x13   :  { %s1990_s23 = scalar_lea.hbm %s2547_s1, 512 }
  0x14   :  { %p1991_p8 = scmp.ne.s32.totalorder %s2547_s1, %s1990_s23  ;;  %p1994_p9 = scmp.lt.u32.totalorder %s1990_s23, %s2547_s1 }
  0x16   :  { %p1996_p10 = pnand %p1994_p9, %p1991_p8 }
  0x18   :  { %1999 = shalt.err (!%p1996_p10)
}
  0x19   :  { %s2000_s29 = scalar_lea.vmem %s2108_s30, 512  ;;  %p2005_p12 = scmp.lt.s32.totalorder %s2108_s30, %s2108_s30 }
  0x1a   :  { %p2001_p11 = scmp.ne.s32.totalorder %s2108_s30, %s2000_s29  ;;  %p2006_p13 = scmp.lt.s32.totalorder %s2000_s29, %s2000_s29 }
  0x1c   :  { %p2007_p0 = por %p2006_p13, %p2005_p12 }
  0x1e   :  { %p2008_p1 = pnand %p2007_p0, %p2001_p11 }
  0x20   :  { %2011 = shalt.err (!%p2008_p1)
}
  0x21   :  { %28 = dma.hbm_to_vmem [thread:$0]  %s2547_s1, 512, %s2108_s30, [#allocation3], %s2040_s17, %s2040_s17, %s2041_s18  }
  0x22   :  { %s2042_s9 = smov [#allocation6]   ;;  %s2012_s13 = scalar_lea.hbm %s2553_s7, 1024 }
  0x23   :  { %s54_s10 = sshll.u32 %s2042_s9, 4  ;;  %p2013_p2 = scmp.ne.s32.totalorder %s2553_s7, %s2012_s13  ;;  %s55_s10 = int_to_ptr.vmem [resolvable:$true] %s54_s10 }
  0x24   :  { %p2016_p3 = scmp.lt.u32.totalorder %s2012_s13, %s2553_s7 }
  0x26   :  { %p2018_p4 = pnand %p2016_p3, %p2013_p2 }
  0x28   :  { %2021 = shalt.err (!%p2018_p4)
}
  0x29   :  { %s2022_s20 = scalar_lea.vmem %s55_s10, 1024  ;;  %p2027_p6 = scmp.lt.s32.totalorder %s55_s10, %s55_s10 }
  0x2a   :  { %p2023_p5 = scmp.ne.s32.totalorder %s55_s10, %s2022_s20  ;;  %p2028_p7 = scmp.lt.s32.totalorder %s2022_s20, %s2022_s20 }
  0x2c   :  { %p2029_p8 = por %p2028_p7, %p2027_p6 }
  0x2e   :  { %p2030_p9 = pnand %p2029_p8, %p2023_p5 }
  0x30   :  { %2033 = shalt.err (!%p2030_p9)
}
  0x31   :  { %s2043_s1 = smov 256   ;;  %s2044_s30 = smov 16  }
  0x32   :  { %60 = dma.hbm_to_vmem [thread:$0]  %s2553_s7, 1024, %s55_s10, [#allocation5], %s2043_s1, %s2043_s1, %s2044_s30  }
  0x33   :  { %2034 = dma.done.wait [#allocation3], 512  }
  0x34   :  { %2035 = vsyncadd [#allocation3], 4294966784 }
  0x35   :  { %2036 = dma.done.wait [#allocation5], 2176  }
  0x36   :  { %2037 = vsyncadd [#allocation5], 4294965120  ;;  %v2045_v0 = vmov 0   ;;  %vm112_vm0 = vcmask 1043456   ;;  %v2046_v1 = vmov 0.0|0.0   ;;  %vm113_vm1 = vcmask 1044480  }
  0x37   :  { %154 = vmatprep.mubr.bf16.mxu0 %v2045_v0  ;;  %1720 = vmatprep.subr.bf16.mxu1 %v2046_v1  ;;  %v2047_v2 = vmov 65535   ;;  %v1914_v4 = vld [vmem:[#allocation2 + $0x4] ss:$8 sps:$4 sm:$0xff]   ;;  %v1916_v5 = vld [vmem:[#allocation2] ss:$8 sps:$4 sm:$0xff]   ;;  %v165_v15 = vld [vmem:[%s2551_s5 + $0x10] sm:$0xff] }
  0x38   :  { %v114_v3 = vsel %vm112_vm0, 4294967295, %v2047_v2  ;;  %122 = vmatprep.subr.bf16.mxu0 %v1914_v4  ;;  %v1917_v7 = vld [vmem:[#allocation2 + $0x14] ss:$8 sps:$4 sm:$0x1f]   ;;  %v71_v9 = vld [vmem:[%s2546_s0] sm:$0xff]  ;;  %v164_v11 = vld [vmem:[%s2551_s5 + $0x8] sm:$0xff] }
  0x39   :  { %v115_v6 = vsel %vm113_vm1, %v114_v3, 0  ;;  %v1919_v8 = vld [vmem:[#allocation2 + $0x10] ss:$8 sps:$4 sm:$0x1f]   ;;  %123 = vmatpush1.bf16.msra.mxu0 %v1916_v5  ;;  %v163_v10 = vld [vmem:[%s2551_s5] sm:$0xff]  ;;  %v85_v17 = vpack.c.bf16 %v71_v9, %v71_v9  ;;  %vm108_vm2 = vcmask 203776  }
  0x3a   :  { %v120_v12 = vand.u32 %v1917_v7, %v115_v6  ;;  %v117_v13 = vand.u32 %v1919_v8, %v115_v6  ;;  %v1721_v14 = vpack.c.bf16 %v164_v11, %v163_v10  ;;  %v166_v16 = vld [vmem:[%s2551_s5 + $0x18] sm:$0xff]  ;;  %v167_v19 = vld [vmem:[%s2551_s5 + $0x20] sm:$0xff]  ;;  %v168_v20 = vld [vmem:[%s2551_s5 + $0x28] sm:$0xff]  ;;  %v2048_v49 = vmov 0.0   ;;  %s2050_s22 = smov 112   ;;  %s2051_s23 = smov 80  }
  0x3b   :  { %v1724_v18 = vpack.c.bf16 %v166_v16, %v165_v15  ;;  %v169_v21 = vld [vmem:[%s2551_s5 + $0x30] sm:$0xff]  ;;  %v170_v22 = vld [vmem:[%s2551_s5 + $0x38] sm:$0xff]  ;;  %v1727_v23 = vpack.c.bf16 %v168_v20, %v167_v19  ;;  %v171_v24 = vld [vmem:[%s2551_s5 + $0x40] sm:$0xff]  ;;  %vm194_vm3 = vcmask 588800   ;;  %vm374_vm4 = vcmask 64512   ;;  %s2052_s24 = smov 120  }
  0x3c   :  { %124 = vmatprep.subr.bf16.mxu0 %v120_v12  ;;  %1722 = vmatpush1.bf16.msra.mxu1 %v1721_v14  ;;  %v172_v25 = vld [vmem:[%s2551_s5 + $0x48] sm:$0xff]  ;;  %v1730_v26 = vpack.c.bf16 %v170_v22, %v169_v21  ;;  %v173_v27 = vld [vmem:[%s2551_s5 + $0x50] sm:$0xff]  ;;  %v174_v28 = vld [vmem:[%s2551_s5 + $0x58] sm:$0xff]  ;;  %s2053_s25 = smov 48   ;;  %s2054_s26 = smov 72   ;;  %vm642_vm5 = vcmask 130048  }
  0x3d   :  { %125 = vmatpush1.bf16.msra.mxu0 %v117_v13  ;;  %1723 = vmatprep.subr.bf16.mxu1 %v2046_v1  ;;  %v1733_v29 = vpack.c.bf16 %v172_v25, %v171_v24  ;;  %v175_v30 = vld [vmem:[%s2551_s5 + $0x60] sm:$0xff]  ;;  %v176_v31 = vld [vmem:[%s2551_s5 + $0x68] sm:$0xff]  ;;  %v1736_v32 = vpack.c.bf16 %v174_v28, %v173_v27  ;;  %v177_v34 = vld [vmem:[%s2551_s5 + $0x70] sm:$0xff]  ;;  %s2055_s27 = smov 40   ;;  %s2056_s29 = smov 32   ;;  %vm644_vm6 = vcmask 195584  }
  0x3e   :  { %1756 = vmatprep.subr.bf16.mxu0 %v2046_v1  ;;  %v1739_v33 = vpack.c.bf16 %v176_v31, %v175_v30  ;;  %v178_v35 = vld [vmem:[%s2551_s5 + $0x78] sm:$0xff]  ;;  %v179_v37 = vld [vmem:[%s2551_s5 + $0x80] sm:$0xff]  ;;  %v180_v38 = vld [vmem:[%s2551_s5 + $0x88] sm:$0xff]  ;;  %s2057_s2 = smov 104   ;;  %vm646_vm7 = vcmask 261120   ;;  %vm648_vm8 = vcmask 326656  }
  0x3f   :  { %v1742_v36 = vpack.c.bf16 %v178_v35, %v177_v34  ;;  %v1745_v39 = vpack.c.bf16 %v180_v38, %v179_v37  ;;  %v181_v40 = vld [vmem:[%s2551_s5 + $0x90] sm:$0xff]  ;;  %v182_v41 = vld [vmem:[%s2551_s5 + $0x98] sm:$0xff]  ;;  %v183_v43 = vld [vmem:[%s2551_s5 + $0xa0] sm:$0xff]  ;;  %v523_v38 = vlaneseq  ;;  %vm650_vm9 = vcmask 392192   ;;  %s2061_s12 = smov 39  }
  0x40   :  { %1531 = vmatmul.mubr.msk.bf16.vlgmr.msra.gmra.mrb[0].mxu0 %vm108_vm2, %v85_v17  ;;  %1725 = vmatpush1.bf16.msra.mxu1 %v1724_v18  ;;  %v1748_v42 = vpack.c.bf16 %v182_v41, %v181_v40  ;;  %v184_v44 = vld [vmem:[%s2551_s5 + $0xa8] sm:$0xff]  ;;  %v185_v46 = vld [vmem:[%s2551_s5 + $0xb0] sm:$0xff]  ;;  %v186_v47 = vld [vmem:[%s2551_s5 + $0xb8] sm:$0xff]  ;;  %vm652_vm10 = vcmask 457728   ;;  %vm654_vm11 = vcmask 523264   ;;  %vm1246_vm12 = vcmask 1041408  }
  0x41   :  { %1758 = vmatpush1.bf16.msra.mxu0 %v1721_v14  ;;  %1726 = vmatprep.subr.bf16.mxu1 %v2046_v1  ;;  %v1751_v45 = vpack.c.bf16 %v184_v44, %v183_v43  ;;  %v1754_v48 = vpack.c.bf16 %v186_v47, %v185_v46  ;;  %v187_v50 = vld [vmem:[%s2551_s5 + $0xc0] sm:$0xff]  ;;  %v73_v20 = vld [vmem:[#allocation6 + $0x8] sm:$0xff]  ;;  %v72_v21 = vld [vmem:[#allocation6] sm:$0xff]  ;;  %s2049_s5 = smov 88   ;;  %vm2062_vm13 = vmmov 0   ;;  %vm1242_vm14 = vcmask 556032  }
  0x42   :  { %1759 = vmatprep.subr.bf16.mxu0 %v2046_v1  ;;  %v79_v35 = vld [vmem:[#allocation6 + $0x31] ss:$0 sm:$0xff] }
  0x44   :  { %1728 = vmatpush1.bf16.msra.mxu1 %v1727_v23 }
  0x45   :  { %1761 = vmatpush1.bf16.msra.mxu0 %v1724_v18  ;;  %1729 = vmatprep.subr.bf16.mxu1 %v2046_v1 }
  0x46   :  { %1762 = vmatprep.subr.bf16.mxu0 %v2046_v1 }
  0x48   :  { %1731 = vmatpush1.bf16.msra.mxu1 %v1730_v26 }
  0x49   :  { %1764 = vmatpush1.bf16.msra.mxu0 %v1727_v23  ;;  %1732 = vmatprep.subr.bf16.mxu1 %v2046_v1 }
  0x4a   :  { %1765 = vmatprep.subr.bf16.mxu0 %v2046_v1 }
  0x4c   :  { %1734 = vmatpush1.bf16.msra.mxu1 %v1733_v29 }
  0x4d   :  { %1767 = vmatpush1.bf16.msra.mxu0 %v1730_v26  ;;  %1735 = vmatprep.subr.bf16.mxu1 %v2046_v1 }
  0x4e   :  { %1768 = vmatprep.subr.bf16.mxu0 %v2046_v1 }
  0x50   :  { %1737 = vmatpush1.bf16.msra.mxu1 %v1736_v32 }
  0x51   :  { %1770 = vmatpush1.bf16.msra.mxu0 %v1733_v29  ;;  %1738 = vmatprep.subr.bf16.mxu1 %v2046_v1 }
  0x52   :  { %1771 = vmatprep.subr.bf16.mxu0 %v2046_v1 }
  0x54   :  { %1740 = vmatpush1.bf16.msra.mxu1 %v1739_v33 }
  0x55   :  { %1773 = vmatpush1.bf16.msra.mxu0 %v1736_v32  ;;  %1741 = vmatprep.subr.bf16.mxu1 %v2046_v1  ;;  %v78_v32 = vld [vmem:[#allocation6 + $0x30] ss:$0 sm:$0xff] }
  0x56   :  { %1774 = vmatprep.subr.bf16.mxu0 %v2046_v1 }
  0x58   :  { %1743 = vmatpush1.bf16.msra.mxu1 %v1742_v36 }
  0x59   :  { %1776 = vmatpush1.bf16.msra.mxu0 %v1739_v33  ;;  %1744 = vmatprep.subr.bf16.mxu1 %v2046_v1 }
  0x5a   :  { %1777 = vmatprep.subr.bf16.mxu0 %v2046_v1 }
  0x5c   :  { %1746 = vmatpush1.bf16.msra.mxu1 %v1745_v39 }
  0x5d   :  { %1779 = vmatpush1.bf16.msra.mxu0 %v1742_v36  ;;  %1747 = vmatprep.subr.bf16.mxu1 %v2046_v1 }
  0x5e   :  { %1780 = vmatprep.subr.bf16.mxu0 %v2046_v1 }
  0x60   :  { %1749 = vmatpush1.bf16.msra.mxu1 %v1748_v42 }
  0x61   :  { %1782 = vmatpush1.bf16.msra.mxu0 %v1745_v39  ;;  %1750 = vmatprep.subr.bf16.mxu1 %v2046_v1  ;;  %v524_v39 = vshrl.u32 %v523_v38, 7 }
  0x62   :  { %1783 = vmatprep.subr.bf16.mxu0 %v2046_v1 }
  0x63   :  { %v2278_v40 = vsub.s32 0, %v524_v39 }
  0x64   :  { %1752 = vmatpush1.bf16.msra.mxu1 %v1751_v45 }
  0x65   :  { %1785 = vmatpush1.bf16.msra.mxu0 %v1748_v42  ;;  %1753 = vmatprep.subr.bf16.mxu1 %v2046_v1 }
  0x66   :  { %1786 = vmatprep.subr.bf16.mxu0 %v2046_v1 }
  0x68   :  { %1755 = vmatpush1.bf16.msra.mxu1 %v1754_v48 }
  0x69   :  { %1788 = vmatpush1.bf16.msra.mxu0 %v1751_v45  ;;  %268 = vmatprep.subr.mxu1 %v2048_v49 }
  0x6a   :  { %1789 = vmatprep.subr.bf16.mxu0 %v2046_v1 }
  0x6c   :  { %269 = vmatpush1.msra.mxu1 %v187_v50 }
  0x6d   :  { %1791 = vmatpush1.bf16.msra.mxu0 %v1754_v48  ;;  %452 = vmatprep.subr.mxu1 %v73_v20 }
  0x6e   :  { %341 = vmatprep.subr.mxu0 %v2048_v49 }
  0x71   :  { %342 = vmatpush1.msra.mxu0 %v187_v50 }
  0x72   :  { %378 = vmatprep.subr.mxu0 %v73_v20 }
 0x113   :  { %v2257_v51 = vpop.f32.mrb[0].mxu0 }
 0x114   :  { %v188_v52 = vrot.slane %v2257_v51, 4  ;;  %v202_v53 = vmul.f32 %v2257_v51, %v2257_v51  ;;  %v2262_v54 = vpop.f32.mrb[1].mxu0 }
 0x115   :  { %v195_v55 = vsel %vm194_vm3, %v2262_v54, 0.0  ;;  %v203_v56 = vmul.f32 %v2262_v54, %v2262_v54  ;;  %v160_v57 = vpop.f32.mrb[2].mxu0 }
 0x116   :  { %v189_v58 = vadd.f32 %v188_v52, %v2257_v51  ;;  %v204_v59 = vrot.slane %v202_v53, 4  ;;  %v196_v60 = vrot.slane %v195_v55, 4  ;;  %v161_v61 = vpop.f32.mrb[3].mxu0 }
 0x117   :  { %v210_v62 = vsel %vm194_vm3, %v203_v56, 0.0  ;;  %v1923_v61 = vld [vmem:[#allocation4 + $0x10] ss:$8 sps:$4 sm:$0xff]  }
 0x118   :  { %v190_v63 = vrot.slane %v189_v58, 2  ;;  %v205_v1 = vadd.f32 %v204_v59, %v202_v53  ;;  %v197_v2 = vadd.f32 %v196_v60, %v195_v55  ;;  %v211_v3 = vrot.slane %v210_v62, 4  ;;  %v1920_v59 = vld [vmem:[#allocation4] ss:$8 sps:$4 sm:$0xff]   ;;  %v1922_v60 = vld [vmem:[#allocation4 + $0x4] ss:$8 sps:$4 sm:$0xff]  }
 0x11a   :  { %v206_v4 = vrot.slane %v205_v1, 2  ;;  %v212_v5 = vadd.f32 %v211_v3, %v210_v62  ;;  %v198_v6 = vrot.slane %v197_v2, 2  ;;  %v191_v7 = vadd.f32 %v190_v63, %v189_v58  ;;  %v1925_v62 = vld [vmem:[#allocation4 + $0x14] ss:$8 sps:$4 sm:$0xff]  }
 0x11c   :  { %v213_v8 = vrot.slane %v212_v5, 2  ;;  %v199_v9 = vadd.f32 %v198_v6, %v197_v2  ;;  %v207_v10 = vadd.f32 %v206_v4, %v205_v1  ;;  %v192_v11 = vrot.slane %v191_v7, 1 }
 0x11e   :  { %v214_v12 = vadd.f32 %v213_v8, %v212_v5  ;;  %v200_v13 = vrot.slane %v199_v9, 1  ;;  %v208_v14 = vrot.slane %v207_v10, 1  ;;  %v193_v17 = vadd.f32 %v192_v11, %v191_v7  ;;  %v1926_v8 = vld [vmem:[#allocation4 + $0x20] ss:$8 sps:$4 sm:$0xff]  }
 0x120   :  { %v201_v15 = vadd.f32 %v200_v13, %v199_v9  ;;  %v215_v16 = vrot.slane %v214_v12, 1  ;;  %v209_v19 = vadd.f32 %v208_v14, %v207_v10  ;;  %v1928_v9 = vld [vmem:[#allocation4 + $0x24] ss:$8 sps:$4 sm:$0xff]  }
 0x122   :  { %1532 = vmatprep.mubr.msk.f32.mxu1 %vm194_vm3, %v201_v15  ;;  %v216_v18 = vadd.f32 %v215_v16, %v214_v12 }
 0x123   :  { %285 = vmatmul.mubr.f32.vlgmr.msra.gmra.mrb[0].mxu1 %v193_v17 }
 0x124   :  { %1533 = vmatprep.mubr.msk.f32.mxu0 %vm194_vm3, %v216_v18  ;;  %516 = vmatprep.mubr.f32.mxu1 %v2048_v49  ;;  %v1931_v18 = vld [vmem:[#allocation4 + $0x34] ss:$8 sps:$4 sm:$0xff]  }
 0x125   :  { %358 = vmatmul.mubr.f32.vlgmr.msra.gmra.mrb[4].mxu0 %v209_v19  ;;  %453 = vmatpush1.msra.mxu1 %v72_v21 }
 0x126   :  { %442 = vmatprep.mubr.f32.mxu0 %v2048_v49  ;;  %379 = vmatpush1.msra.mxu0 %v72_v21 }
 0x127   :  { %720 = vmatprep.subr.bf16.mxu0 %v1922_v60  ;;  %v764_v60 = vld [vmem:[%s2552_s6 + $0x18] sm:$0xff] }
 0x1f6   :  { %v286_v22 = vpop.f32.mrb[0].mxu1 }
 0x1f7   :  { %v364_v23 = vmul.f32 0.005, %v286_v22  ;;  %v288_v24 = vpop.f32.mrb[1].mxu1 }
 0x1f8   :  { %v359_v25 = vpop.f32.mrb[4].mxu0 }
 0x1f9   :  { %v366_v26 = vmul.f32 %v364_v23, %v364_v23  ;;  %v365_v27 = vmul.f32 0.005, %v359_v25  ;;  %v361_v28 = vpop.f32.mrb[5].mxu0 }
 0x1fb   :  { %v367_v29 = vsub.f32 %v365_v27, %v366_v26 }
 0x1fd   :  { %v368_v30 = vmax.f32 %v367_v29, 0.0  ;;  %v665_v29 = vld [vmem:[#allocation4 + $0x40] sm:$0xff] }
 0x1ff   :  { %v369_v31 = vadd.f32 1e-05, %v368_v30 }
 0x201   :  { %1955 = vrsqrt.f32 %v369_v31  ;;  %v1545_v31 = vcombine.high %v665_v29, %v665_v29 }
 0x20b   :  { %v1956_v33 = vpop.eup %1955 }
 0x20c   :  { %v371_v34 = vmul.f32 %v1956_v33, %v78_v32  ;;  %v1544_v32 = vcombine.low %v665_v29, %v665_v29 }
 0x20e   :  { %1534 = vmatmul.mubr.msk.f32.vlgmr.msra.gmra.mrb[6].mxu0 %vm374_vm4, %v371_v34  ;;  %v372_v36 = vmul.f32 %v371_v34, %v364_v23  ;;  %v1929_v23 = vld [vmem:[#allocation4 + $0x30] ss:$8 sps:$4 sm:$0xff]   ;;  %v715_v39 = vsel %vm112_vm0, %v1544_v32, 0 }
 0x20f   :  { %752 = vmatprep.mubr.bf16.mxu0 %v2045_v0  ;;  %721 = vmatpush1.bf16.msra.mxu0 %v1920_v59  ;;  %v763_v59 = vld [vmem:[%s2552_s6 + $0x10] sm:$0xff] }
 0x210   :  { %v373_v37 = vsub.f32 %v79_v35, %v372_v36  ;;  %722 = vmatprep.subr.bf16.mxu0 %v1925_v62  ;;  %v1798_v62 = vpack.c.bf16 %v764_v60, %v763_v59 }
 0x212   :  { %1535 = vmatmul.mubr.msk.f32.vlgmr.msra.gmra.mrb[2].mxu1 %vm374_vm4, %v373_v37 }
 0x213   :  { %723 = vmatpush1.bf16.msra.mxu0 %v1923_v61 }
 0x214   :  { %724 = vmatprep.subr.bf16.mxu0 %v1928_v9 }
 0x217   :  { %725 = vmatpush1.bf16.msra.mxu0 %v1926_v8  ;;  %v767_v8 = vld [vmem:[%s2552_s6 + $0x30] sm:$0xff] }
 0x218   :  { %726 = vmatprep.subr.bf16.mxu0 %v1931_v18 }
 0x21b   :  { %727 = vmatpush1.bf16.msra.mxu0 %v1929_v23 }
 0x21c   :  { %1546 = vmatprep.subr.msk.bf16.mxu0 %vm112_vm0, %v1545_v31 }
 0x21f   :  { %729 = vmatpush1.bf16.msra.mxu0 %v715_v39  ;;  %v771_v39 = vld [vmem:[%s2552_s6 + $0x50] sm:$0xff] }
 0x2e1   :  { %v444_v41 = vpop.f32.mrb[6].mxu0 }
 0x2e2   :  { %v526_v42 = vrot.slane %v444_v41, %v2278_v40  ;;  %v446_v43 = vpop.f32.mrb[7].mxu0 }
 0x2e3   :  { %v530_v44 = vrot.slane %v446_v43, %v2278_v40 }
 0x2e4   :  { %v531_v45 = vmul.f32 %v526_v42, %v2257_v51 }
 0x2e5   :  { %v532_v46 = vmul.f32 %v530_v44, %v2262_v54  ;;  %v518_v47 = vpop.f32.mrb[2].mxu1 }
 0x2e6   :  { %v536_v0 = vrot.slane %v518_v47, %v2278_v40  ;;  %v520_v48 = vpop.f32.mrb[3].mxu1 }
 0x2e7   :  { %v540_v50 = vrot.slane %v520_v48, %v2278_v40  ;;  %v777_v48 = vld [vmem:[%s2552_s6 + $0x80] sm:$0xff] }
 0x2e8   :  { %v541_v52 = vadd.f32 %v536_v0, %v531_v45 }
 0x2e9   :  { %v542_v53 = vadd.f32 %v540_v50, %v532_v46  ;;  %v778_v50 = vld [vmem:[%s2552_s6 + $0x88] sm:$0xff] }
 0x2ea   :  { %v2286_v55 = vmax.f32 %v541_v52, 0.0  ;;  %v761_v52 = vld [vmem:[%s2552_s6] sm:$0xff] }
 0x2eb   :  { %v544_v56 = vmax.f32 %v542_v53, 0.0  ;;  %v1792_v53 = vpack.c.bf16 %v778_v50, %v777_v48  ;;  %v791_v48 = vld [vmem:[%s2552_s6 + $0xf0] sm:$0xff]  ;;  %v792_v50 = vld [vmem:[%s2552_s6 + $0xf8] sm:$0xff] }
 0x2ec   :  { %550 = vrot.lane.b32.xlu1 %v2286_v55, %s2049_s5  ;;  %558 = vrot.lane.b32.xlu0 %v2286_v55, %s2050_s22 }
 0x2ed   :  { %v1889_v51 = vpack.i.bf16 %v544_v56, %v2286_v55  ;;  %v1894_v54 = vpack.i.bf16 %v2286_v55, %v544_v56  ;;  %1793 = vmatprep.subr.bf16.mxu1 %v1792_v53  ;;  %1825 = vmatprep.subr.bf16.mxu0 %v1792_v53  ;;  %v1820_v53 = vpack.c.bf16 %v792_v50, %v791_v48 }
 0x2f0   :  { %554 = vrot.lane.b32.xlu1 %v2286_v55, %s2051_s23  ;;  %1890 = vrot.lane.b32.xlu0 %v1889_v51, %s2052_s24  ;;  %v780_v51 = vld [vmem:[%s2552_s6 + $0x98] sm:$0xff] }
 0x2f4   :  { %1895 = vrot.lane.b32.xlu1 %v1894_v54, %s2053_s25  ;;  %564 = vrot.lane.b32.xlu0 %v2286_v55, %s2054_s26 }
 0x2f8   :  { %573 = vrot.lane.b32.xlu1 %v544_v56, %s2055_s27  ;;  %601 = vrot.lane.b32.xlu0 %v544_v56, %s2050_s22 }
 0x2fc   :  { %582 = vrot.lane.b32.xlu1 %v544_v56, %s2056_s29  ;;  %592 = vrot.lane.b32.xlu0 %v544_v56, %s2049_s5 }
 0x300   :  { %607 = vrot.lane.b32.xlu1 %v544_v56, %s2054_s26  ;;  %596 = vrot.lane.b32.xlu0 %v544_v56, %s2051_s23 }
 0x35e   :  { %v551_v57 = vpop.permute.xlu1 %550  ;;  %v559_v58 = vpop.permute.xlu0 %558 }
 0x362   :  { %v555_v63 = vpop.permute.xlu1 %554  ;;  %v1891_v1 = vpop.permute.xlu0 %1890 }
 0x363   :  { %v1892_v2 = vunpack.i.l.bf16 %v1891_v1  ;;  %v1893_v10 = vunpack.i.h.bf16 %v1891_v1  ;;  %v782_v1 = vld [vmem:[%s2552_s6 + $0xa8] sm:$0xff] }
 0x365   :  { %v549_v3 = vmax.f32 %v2286_v55, %v1892_v2  ;;  %v600_v22 = vmax.f32 %v544_v56, %v1893_v10  ;;  %v591_v36 = vmax.f32 %v2286_v55, %v1893_v10  ;;  %v762_v55 = vld [vmem:[%s2552_s6 + $0x8] sm:$0xff]  ;;  %v779_v56 = vld [vmem:[%s2552_s6 + $0x90] sm:$0xff]  ;;  %v765_v2 = vld [vmem:[%s2552_s6 + $0x20] sm:$0xff] }
 0x366   :  { %v1896_v4 = vpop.permute.xlu1 %1895  ;;  %v565_v5 = vpop.permute.xlu0 %564  ;;  %v768_v10 = vld [vmem:[%s2552_s6 + $0x38] sm:$0xff] }
 0x367   :  { %v553_v6 = vmax.f32 %v549_v3, %v551_v57  ;;  %v561_v7 = vmax.f32 %v549_v3, %v559_v58  ;;  %v1897_v12 = vunpack.i.l.bf16 %v1896_v4  ;;  %v1898_v19 = vunpack.i.h.bf16 %v1896_v4  ;;  %v766_v4 = vld [vmem:[%s2552_s6 + $0x28] sm:$0xff] }
 0x368   :  { %v1796_v58 = vpack.c.bf16 %v780_v51, %v779_v56 }
 0x369   :  { %v557_v11 = vmax.f32 %v553_v6, %v555_v63  ;;  %v562_v13 = vmax.f32 %v561_v7, %v551_v57  ;;  %v1794_v57 = vpack.c.bf16 %v762_v55, %v761_v52  ;;  %v783_v6 = vld [vmem:[%s2552_s6 + $0xb0] sm:$0xff]  ;;  %v784_v7 = vld [vmem:[%s2552_s6 + $0xb8] sm:$0xff] }
 0x36a   :  { %v574_v14 = vpop.permute.xlu1 %573  ;;  %v602_v15 = vpop.permute.xlu0 %601  ;;  %v1804_v9 = vpack.c.bf16 %v784_v7, %v783_v6  ;;  %v775_v52 = vld [vmem:[%s2552_s6 + $0x70] sm:$0xff]  ;;  %v776_v55 = vld [vmem:[%s2552_s6 + $0x78] sm:$0xff] }
 0x36b   :  { %v586_v16 = vmax.f32 %v557_v11, %v1897_v12  ;;  %v563_v17 = vmax.f32 %v562_v13, %v555_v63  ;;  %614 = vrot.lane.b32.xlu0 %v557_v11, %s2052_s24  ;;  %v571_v26 = vmax.f32 %v557_v11, %v1898_v19  ;;  %v604_v28 = vmax.f32 %v600_v22, %v602_v15  ;;  %v781_v63 = vld [vmem:[%s2552_s6 + $0xa0] sm:$0xff]  ;;  %v786_v13 = vld [vmem:[%s2552_s6 + $0xc8] sm:$0xff]  ;;  %s2060_s24 = smov 64  }
 0x36c   :  { %1795 = vmatpush3.bf16.msra.mxu1 %v1794_v57  ;;  %v1800_v3 = vpack.c.bf16 %v782_v1, %v781_v63  ;;  %v1822_v56 = vpack.c.bf16 %v776_v55, %v775_v52 }
 0x36d   :  { %v567_v20 = vmax.f32 %v563_v17, %v565_v5  ;;  %v587_v21 = vmax.f32 %v586_v16, %v574_v14  ;;  %v576_v41 = vmax.f32 %v571_v26, %v574_v14  ;;  %1797 = vmatprep.subr.bf16.mxu1 %v1796_v58  ;;  %v1802_v5 = vpack.c.bf16 %v766_v4, %v765_v2 }
 0x36e   :  { %v583_v24 = vpop.permute.xlu1 %582  ;;  %v593_v25 = vpop.permute.xlu0 %592 }
 0x36f   :  { %v580_v27 = vmax.f32 %v567_v20, %v1897_v12  ;;  %626 = vrot.lane.b32.xlu0 %v587_v21, %s2057_s2  ;;  %v2302_v30 = vsel %vm374_vm4, %v557_v11, %v567_v20  ;;  %v605_v34 = vmax.f32 %v604_v28, %v593_v25  ;;  %v611_v35 = vmax.f32 %v600_v22, %v593_v25  ;;  %s2058_s2 = smov 56   ;;  %v785_v12 = vld [vmem:[%s2552_s6 + $0xc0] sm:$0xff] }
 0x370   :  { %v595_v47 = vmax.f32 %v591_v36, %v593_v25  ;;  %1799 = vmatpush3.bf16.msra.mxu1 %v1798_v62  ;;  %v1806_v11 = vpack.c.bf16 %v768_v10, %v767_v8  ;;  %v788_v36 = vld [vmem:[%s2552_s6 + $0xd8] sm:$0xff] }
 0x371   :  { %v581_v33 = vmax.f32 %v580_v27, %v574_v14  ;;  %1801 = vmatprep.subr.bf16.mxu1 %v1800_v3  ;;  %v1808_v14 = vpack.c.bf16 %v786_v13, %v785_v12 }
 0x372   :  { %v597_v37 = vpop.permute.xlu0 %596  ;;  %v608_v45 = vpop.permute.xlu1 %607 }
 0x373   :  { %v585_v42 = vmax.f32 %v581_v33, %v583_v24  ;;  %v606_v43 = vmax.f32 %v605_v34, %v597_v37  ;;  %v612_v44 = vmax.f32 %v611_v35, %v597_v37  ;;  %v599_v54 = vmax.f32 %v595_v47, %v597_v37  ;;  %v770_v33 = vld [vmem:[%s2552_s6 + $0x48] sm:$0xff]  ;;  %v787_v35 = vld [vmem:[%s2552_s6 + $0xd0] sm:$0xff] }
 0x374   :  { %1803 = vmatpush3.bf16.msra.mxu1 %v1802_v5  ;;  %v1812_v37 = vpack.c.bf16 %v788_v36, %v787_v35  ;;  %v774_v47 = vld [vmem:[%s2552_s6 + $0x68] sm:$0xff] }
 0x375   :  { %v1899_v46 = vpack.i.bf16 %v585_v42, %v576_v41  ;;  %v610_v0 = vmax.f32 %v606_v43, %v608_v45  ;;  %638 = vrot.lane.b32.xlu0 %v612_v44, %s2053_s25  ;;  %1805 = vmatprep.subr.bf16.mxu1 %v1804_v9  ;;  %v772_v41 = vld [vmem:[%s2552_s6 + $0x58] sm:$0xff]  ;;  %v789_v43 = vld [vmem:[%s2552_s6 + $0xe0] sm:$0xff]  ;;  %v790_v44 = vld [vmem:[%s2552_s6 + $0xe8] sm:$0xff] }
 0x376   :  { %v1814_v42 = vpack.c.bf16 %v772_v41, %v771_v39  ;;  %v1816_v45 = vpack.c.bf16 %v790_v44, %v789_v43 }
 0x377   :  { %1900 = vrot.lane.b32.xlu1 %v1899_v46, %s2050_s22  ;;  %v1904_v61 = vpack.i.bf16 %v610_v0, %v599_v54  ;;  %v773_v46 = vld [vmem:[%s2552_s6 + $0x60] sm:$0xff] }
 0x378   :  { %1807 = vmatpush3.bf16.msra.mxu1 %v1806_v11  ;;  %v1818_v0 = vpack.c.bf16 %v774_v47, %v773_v46 }
 0x379   :  { %1809 = vmatprep.subr.bf16.mxu1 %v1808_v14 }
 0x37b   :  { %1905 = vrot.lane.b32.xlu1 %v1904_v61, %s2058_s2 }
 0x3dd   :  { %v615_v15 = vpop.permute.xlu0 %614 }
 0x3de   :  { %v643_v19 = vsel %vm642_vm5, %v2302_v30, %v615_v15  ;;  %v769_v30 = vld [vmem:[%s2552_s6 + $0x40] sm:$0xff]  ;;  %s2059_s6 = smov 96  }
 0x3df   :  { %v1810_v34 = vpack.c.bf16 %v770_v33, %v769_v30 }
 0x3e1   :  { %v627_v21 = vpop.permute.xlu0 %626  ;;  %1811 = vmatpush3.bf16.msra.mxu1 %v1810_v34 }
 0x3e2   :  { %1813 = vmatprep.subr.bf16.mxu1 %v1812_v37 }
 0x3e5   :  { %1815 = vmatpush3.bf16.msra.mxu1 %v1814_v42 }
 0x3e6   :  { %1817 = vmatprep.subr.bf16.mxu1 %v1816_v45 }
 0x3e7   :  { %v639_v28 = vpop.permute.xlu0 %638 }
 0x3e9   :  { %v1901_v16 = vpop.permute.xlu1 %1900  ;;  %1819 = vmatpush3.bf16.msra.mxu1 %v1818_v0 }
 0x3ea   :  { %v1903_v17 = vunpack.i.h.bf16 %v1901_v16  ;;  %v1902_v18 = vunpack.i.l.bf16 %v1901_v16  ;;  %1821 = vmatprep.subr.bf16.mxu1 %v1820_v53 }
 0x3ec   :  { %v645_v20 = vsel %vm644_vm6, %v643_v19, %v1902_v18 }
 0x3ed   :  { %v647_v22 = vsel %vm646_vm7, %v645_v20, %v1903_v17  ;;  %v1906_v23 = vpop.permute.xlu1 %1905  ;;  %1823 = vmatpush3.bf16.msra.mxu1 %v1822_v56 }
 0x3ee   :  { %v1908_v24 = vunpack.i.h.bf16 %v1906_v23  ;;  %v1907_v25 = vunpack.i.l.bf16 %v1906_v23  ;;  %v649_v26 = vsel %vm648_vm8, %v647_v22, %v627_v21  ;;  %v75_v22 = vld [vmem:[#allocation6 + $0x18] sm:$0xff]  ;;  %v77_v23 = vld [vmem:[#allocation6 + $0x28] sm:$0xff] }
 0x3f0   :  { %v651_v27 = vsel %vm650_vm9, %v649_v26, %v1907_v25  ;;  %v1856_v25 = vpack.c.bf16 %v77_v23, %v75_v22  ;;  %v76_v26 = vld [vmem:[#allocation6 + $0x20] sm:$0xff] }
 0x3f1   :  { %v653_v29 = vsel %vm652_vm10, %v651_v27, %v1908_v24  ;;  %v74_v24 = vld [vmem:[#allocation6 + $0x10] sm:$0xff]  ;;  %v1939_v23 = vld [vmem:[%s2550_s4] ss:$8 sps:$4 sm:$0xff]  }
 0x3f2   :  { %v655_v31 = vsel %vm654_vm11, %v653_v29, %v639_v28  ;;  %v1858_v27 = vpack.c.bf16 %v76_v26, %v74_v24  ;;  %1857 = vmatprep.subr.bf16.mxu1 %v1856_v25 }
 0x3f3   :  { %v656_v32 = vpack.c.bf16 %v655_v31, %v655_v31 }
 0x3f5   :  { %1547 = vmatmul.mubr.msk.bf16.vlgmr.msra.gmra.mrb[8].mxu0 %vm194_vm3, %v656_v32 }
 0x3f6   :  { %1827 = vmatpush3.bf16.msra.mxu0 %v1794_v57 }
 0x3f7   :  { %1829 = vmatprep.subr.bf16.mxu0 %v1796_v58 }
 0x3fa   :  { %1831 = vmatpush3.bf16.msra.mxu0 %v1798_v62 }
 0x3fb   :  { %1833 = vmatprep.subr.bf16.mxu0 %v1800_v3 }
 0x3fe   :  { %1835 = vmatpush3.bf16.msra.mxu0 %v1802_v5 }
 0x3ff   :  { %1837 = vmatprep.subr.bf16.mxu0 %v1804_v9 }
 0x402   :  { %1839 = vmatpush3.bf16.msra.mxu0 %v1806_v11 }
 0x403   :  { %1841 = vmatprep.subr.bf16.mxu0 %v1808_v14 }
 0x406   :  { %1843 = vmatpush3.bf16.msra.mxu0 %v1810_v34 }
 0x407   :  { %1845 = vmatprep.subr.bf16.mxu0 %v1812_v37 }
 0x40a   :  { %1847 = vmatpush3.bf16.msra.mxu0 %v1814_v42  ;;  %v80_v42 = vld [vmem:[#allocation6 + $0x32] ss:$0 sm:$0xff] }
 0x40b   :  { %1849 = vmatprep.subr.bf16.mxu0 %v1816_v45  ;;  %v81_v45 = vld [vmem:[#allocation6 + $0x33] ss:$0 sm:$0xff] }
 0x40e   :  { %1851 = vmatpush3.bf16.msra.mxu0 %v1818_v0 }
 0x40f   :  { %1853 = vmatprep.subr.bf16.mxu0 %v1820_v53 }
 0x412   :  { %1855 = vmatpush3.bf16.msra.mxu0 %v1822_v56 }
 0x413   :  { %1680 = vmatprep.subr.bf16.mxu0 %v2048_v49 }
 0x4c8   :  { %v2412_v51 = vpop.f32.mrb[8].mxu0 }
 0x4c9   :  { %v793_v54 = vrot.slane %v2412_v51, 4  ;;  %v805_v57 = vmul.f32 %v2412_v51, %v2412_v51  ;;  %v2417_v58 = vpop.f32.mrb[9].mxu0 }
 0x4ca   :  { %v799_v59 = vrot.slane %v2417_v58, 4  ;;  %v806_v60 = vmul.f32 %v2417_v58, %v2417_v58  ;;  %v758_v61 = vpop.f32.mrb[10].mxu0 }
 0x4cb   :  { %v794_v62 = vadd.f32 %v793_v54, %v2412_v51  ;;  %v807_v63 = vrot.slane %v805_v57, 4  ;;  %v759_v1 = vpop.f32.mrb[11].mxu0 }
 0x4cc   :  { %v800_v2 = vadd.f32 %v799_v59, %v2417_v58  ;;  %v813_v3 = vrot.slane %v806_v60, 4  ;;  %v1967_v1 = vld [vmem:[%s2546_s0] sm:$0xff] }
 0x4cd   :  { %v795_v4 = vrot.slane %v794_v62, 2  ;;  %v808_v5 = vadd.f32 %v807_v63, %v805_v57 }
 0x4ce   :  { %v801_v6 = vrot.slane %v800_v2, 2  ;;  %v814_v7 = vadd.f32 %v813_v3, %v806_v60 }
 0x4cf   :  { %v796_v8 = vadd.f32 %v795_v4, %v794_v62  ;;  %v809_v9 = vrot.slane %v808_v5, 2 }
 0x4d0   :  { %v802_v10 = vadd.f32 %v801_v6, %v800_v2  ;;  %v815_v11 = vrot.slane %v814_v7, 2 }
 0x4d1   :  { %v797_v12 = vrot.slane %v796_v8, 1  ;;  %v810_v13 = vadd.f32 %v809_v9, %v808_v5 }
 0x4d2   :  { %v803_v14 = vrot.slane %v802_v10, 1  ;;  %v816_v15 = vadd.f32 %v815_v11, %v814_v7 }
 0x4d3   :  { %v811_v16 = vrot.slane %v810_v13, 1  ;;  %v798_v19 = vadd.f32 %v797_v12, %v796_v8 }
 0x4d4   :  { %v804_v17 = vadd.f32 %v803_v14, %v802_v10  ;;  %v817_v18 = vrot.slane %v816_v15, 1  ;;  %v1937_v10 = vld [vmem:[%s2549_s3 + $0x18] sm:$0xff]  }
 0x4d5   :  { %v812_v21 = vadd.f32 %v811_v16, %v810_v13 }
 0x4d6   :  { %883 = vmatprep.mubr.f32.mxu1 %v804_v17  ;;  %v818_v20 = vadd.f32 %v817_v18, %v816_v15  ;;  %v1938_v15 = vld [vmem:[%s2549_s3 + $0x20] ss:$0 sps:$4 sm:$0x33]  }
 0x4d7   :  { %884 = vmatmul.mubr.f32.vlgmr.msra.gmra.mrb[4].mxu1 %v798_v19  ;;  %v1248_v17 = vsel %vm1246_vm12, %v1938_v15, 0 }
 0x4d8   :  { %953 = vmatprep.mubr.f32.mxu0 %v818_v20  ;;  %1037 = vmatprep.mubr.f32.mxu1 %v2048_v49 }
 0x4d9   :  { %954 = vmatmul.mubr.f32.vlgmr.msra.gmra.mrb[12].mxu0 %v812_v21  ;;  %1859 = vmatpush1.bf16.msra.mxu1 %v1858_v27 }
 0x4da   :  { %1861 = vmatprep.subr.bf16.mxu1 %v1856_v25  ;;  %1696 = vmatprep.mubr.msk.bf16.mxu0 %vm2062_vm13, %v2048_v49 }
 0x4db   :  { %1681 = vmatpush3.bf16.msra.mxu0 %v1939_v23 }
 0x4dc   :  { %1682 = vmatprep.subr.bf16.mxu0 %v2048_v49 }
 0x5aa   :  { %v1604_v28 = vpop.f32.mrb[4].mxu1 }
 0x5ab   :  { %v1605_v29 = vpop.f32.mrb[5].mxu1 }
 0x5ac   :  { %v1606_v31 = vadd.f32 %v1605_v29, %v1604_v28  ;;  %v1639_v32 = vpop.f32.mrb[12].mxu0 }
 0x5ad   :  { %v1640_v30 = vpop.f32.mrb[13].mxu0 }
 0x5ae   :  { %v960_v33 = vmul.f32 0.0078125, %v1606_v31  ;;  %v1641_v34 = vadd.f32 %v1640_v30, %v1639_v32 }
 0x5b0   :  { %v962_v35 = vmul.f32 %v960_v33, %v960_v33  ;;  %v961_v36 = vmul.f32 0.0078125, %v1641_v34 }
 0x5b2   :  { %v963_v37 = vsub.f32 %v961_v36, %v962_v35  ;;  %v1941_v35 = vld [vmem:[%s2550_s4 + $0x20] ss:$8 sps:$4 sm:$0xff]  }
 0x5b4   :  { %v964_v39 = vmax.f32 %v963_v37, 0.0  ;;  %v1942_v37 = vld [vmem:[%s2550_s4 + $0x30] ss:$8 sps:$4 sm:$0xff]  }
 0x5b6   :  { %v965_v41 = vadd.f32 1e-05, %v964_v39 }
 0x5b8   :  { %1957 = vrsqrt.f32 %v965_v41 }
 0x5c2   :  { %v1958_v43 = vpop.eup %1957 }
 0x5c3   :  { %v967_v44 = vmul.f32 %v1958_v43, %v80_v42 }
 0x5c5   :  { %1548 = vmatmul.mubr.msk.f32.vlgmr.msra.gmra.mrb[6].mxu1 %vm642_vm5, %v967_v44  ;;  %v968_v46 = vmul.f32 %v967_v44, %v960_v33 }
 0x5c6   :  { %1863 = vmatpush1.bf16.msra.mxu1 %v1858_v27  ;;  %1111 = vmatprep.mubr.f32.mxu1 %v2048_v49  ;;  %v1940_v27 = vld [vmem:[%s2550_s4 + $0x10] ss:$8 sps:$4 sm:$0xff]  }
 0x5c7   :  { %v969_v47 = vsub.f32 %v81_v45, %v968_v46  ;;  %1666 = vmatprep.subr.bf16.mxu1 %v2048_v49  ;;  %1683 = vmatpush3.bf16.msra.mxu0 %v1940_v27 }
 0x5c8   :  { %1684 = vmatprep.subr.bf16.mxu0 %v2048_v49 }
 0x5c9   :  { %1549 = vmatmul.mubr.msk.f32.vlgmr.msra.gmra.mrb[8].mxu1 %vm642_vm5, %v969_v47 }
 0x5ca   :  { %1676 = vmatprep.mubr.msk.bf16.mxu1 %vm2062_vm13, %v2048_v49 }
 0x5cb   :  { %1685 = vmatpush3.bf16.msra.mxu0 %v1941_v35 }
 0x5cc   :  { %1686 = vmatprep.subr.bf16.mxu0 %v2048_v49 }
 0x5cf   :  { %1687 = vmatpush3.bf16.msra.mxu0 %v1942_v37 }
 0x5d0   :  { %1688 = vmatprep.subr.bf16.mxu0 %v2048_v49 }
 0x698   :  { %v1039_v0 = vpop.f32.mrb[6].mxu1 }
 0x699   :  { %v1121_v48 = vrot.slane %v1039_v0, %v2278_v40  ;;  %v1041_v50 = vpop.f32.mrb[7].mxu1  ;;  %v1943_v0 = vld [vmem:[%s2550_s4 + $0x40] ss:$8 sps:$4 sm:$0xff]  }
 0x69a   :  { %v1125_v52 = vrot.slane %v1041_v50, %v2278_v40  ;;  %1689 = vmatpush3.bf16.msra.mxu0 %v1943_v0  ;;  %v1945_v50 = vld [vmem:[%s2550_s4 + $0x60] ss:$8 sps:$4 sm:$0xff]  }
 0x69b   :  { %v1126_v53 = vmul.f32 %v1121_v48, %v2412_v51  ;;  %v1934_v51 = vld [vmem:[%s2549_s3] sm:$0xff]   ;;  %1690 = vmatprep.subr.bf16.mxu0 %v2048_v49  ;;  %v1944_v48 = vld [vmem:[%s2550_s4 + $0x50] ss:$8 sps:$4 sm:$0xff]  }
 0x69c   :  { %v1127_v55 = vmul.f32 %v1125_v52, %v2417_v58  ;;  %v1113_v56 = vpop.f32.mrb[8].mxu1  ;;  %1667 = vmatpush3.bf16.msra.mxu1 %v1934_v51  ;;  %v1936_v58 = vld [vmem:[%s2549_s3 + $0x10] sm:$0xff]  }
 0x69d   :  { %v1131_v54 = vrot.slane %v1113_v56, %v2278_v40  ;;  %v1115_v57 = vpop.f32.mrb[9].mxu1  ;;  %1668 = vmatprep.subr.bf16.mxu1 %v2048_v49  ;;  %v1946_v52 = vld [vmem:[%s2550_s4 + $0x70] ss:$8 sps:$4 sm:$0xff]   ;;  %v1949_v56 = vld [vmem:[%s2550_s4 + $0x24] ss:$8 sps:$4 sm:$0xff]  }
 0x69e   :  { %v1135_v59 = vrot.slane %v1115_v57, %v2278_v40  ;;  %v1935_v40 = vld [vmem:[%s2549_s3 + $0x8] sm:$0xff]   ;;  %1691 = vmatpush3.bf16.msra.mxu0 %v1944_v48  ;;  %v82_v57 = vld [vmem:[#allocation6 + $0x34] ss:$0 sm:$0xff] }
 0x69f   :  { %v1136_v60 = vadd.f32 %v1131_v54, %v1126_v53  ;;  %1692 = vmatprep.subr.bf16.mxu0 %v2048_v49  ;;  %v1947_v53 = vld [vmem:[%s2550_s4 + $0x4] ss:$8 sps:$4 sm:$0xff]   ;;  %v1950_v54 = vld [vmem:[%s2550_s4 + $0x34] ss:$8 sps:$4 sm:$0xff]  }
 0x6a0   :  { %v1137_v61 = vadd.f32 %v1135_v59, %v1127_v55  ;;  %1669 = vmatpush3.bf16.msra.mxu1 %v1935_v40  ;;  %v1948_v55 = vld [vmem:[%s2550_s4 + $0x14] ss:$8 sps:$4 sm:$0xff]  }
 0x6a1   :  { %v1138_v62 = vmax.f32 %v1136_v60, 0.0  ;;  %1670 = vmatprep.subr.bf16.mxu1 %v2048_v49 }
 0x6a2   :  { %v1139_v63 = vmax.f32 %v1137_v61, 0.0  ;;  %1693 = vmatpush3.bf16.msra.mxu0 %v1945_v50 }
 0x6a3   :  { %1153 = vrot.lane.b32.xlu0 %v1138_v62, %s2059_s6  ;;  %1141 = vrot.lane.b32.xlu1 %v1138_v62, %s2050_s22 }
 0x6a4   :  { %1671 = vmatpush3.bf16.msra.mxu1 %v1936_v58  ;;  %1694 = vmatprep.subr.bf16.mxu0 %v2048_v49  ;;  %v1951_v58 = vld [vmem:[%s2550_s4 + $0x44] ss:$8 sps:$4 sm:$0xff]  }
 0x6a5   :  { %1672 = vmatprep.subr.bf16.mxu1 %v2048_v49 }
 0x6a6   :  { %1695 = vmatpush3.bf16.msra.mxu0 %v1946_v52 }
 0x6a7   :  { %1168 = vrot.lane.b32.xlu0 %v1139_v63, %s2053_s25  ;;  %1164 = vrot.lane.b32.xlu1 %v1139_v63, %s2060_s24 }
 0x6a8   :  { %1673 = vmatpush3.bf16.msra.mxu1 %v1937_v10 }
 0x6a9   :  { %1674 = vmatprep.subr.bf16.mxu1 %v2048_v49 }
 0x6ab   :  { %1173 = vrot.lane.b32.xlu0 %v1139_v63, %s2050_s22  ;;  %1179 = vrot.lane.b32.xlu1 %v1139_v63, %s2056_s29 }
 0x6ac   :  { %1675 = vmatpush3.bf16.msra.mxu1 %v1248_v17 }
 0x6ad   :  { %1700 = vmatprep.subr.bf16.mxu1 %v2048_v49 }
 0x6af   :  { %1145 = vrot.lane.b32.xlu0 %v1138_v62, %s2060_s24  ;;  %1185 = vrot.lane.b32.xlu1 %v1139_v63, %s2059_s6 }
 0x6b3   :  { %1159 = vrot.lane.b32.xlu0 %v1138_v62, %s2056_s29  ;;  %1149 = vrot.lane.b32.xlu1 %v1138_v62, %s2053_s25 }
 0x6b7   :  { %1198 = vrot.lane.b32.xlu0 %v1967_v1, %s2061_s12  ;;  %v1952_v1 = vld [vmem:[%s2550_s4 + $0x54] ss:$8 sps:$4 sm:$0xff]  }
 0x715   :  { %v1154_v2 = vpop.permute.xlu0 %1153  ;;  %v1142_v3 = vpop.permute.xlu1 %1141 }
 0x716   :  { %v1144_v4 = vmax.f32 %v1138_v62, %v1142_v3  ;;  %v1954_v3 = vld [vmem:[%s2550_s4 + $0x74] ss:$8 sps:$4 sm:$0xff]  }
 0x718   :  { %v1156_v5 = vmax.f32 %v1144_v4, %v1154_v2  ;;  %v1953_v2 = vld [vmem:[%s2550_s4 + $0x64] ss:$8 sps:$4 sm:$0xff]  }
 0x719   :  { %v1169_v6 = vpop.permute.xlu0 %1168  ;;  %v1165_v7 = vpop.permute.xlu1 %1164 }
 0x71a   :  { %v1167_v8 = vmax.f32 %v1144_v4, %v1165_v7  ;;  %v1177_v9 = vmax.f32 %v1156_v5, %v1165_v7 }
 0x71c   :  { %v1171_v11 = vmax.f32 %v1167_v8, %v1169_v6  ;;  %v1178_v12 = vmax.f32 %v1177_v9, %v1169_v6 }
 0x71d   :  { %v1174_v13 = vpop.permute.xlu0 %1173  ;;  %v1180_v14 = vpop.permute.xlu1 %1179 }
 0x71e   :  { %v1182_v16 = vmax.f32 %v1178_v12, %v1180_v14  ;;  %v1172_v18 = vmax.f32 %v1171_v11, %v1139_v63  ;;  %v1503_v12 = vand.u32 127, %v523_v38 }
 0x720   :  { %v1183_v19 = vmax.f32 %v1182_v16, %v1139_v63  ;;  %v1176_v24 = vmax.f32 %v1172_v18, %v1174_v13  ;;  %vm1517_vm15 = vcmp.eq.s32.totalorder %v1503_v12, 5  ;;  %vm1504_vm0 = vcmp.lt.s32.totalorder %v1503_v12, 5 }
 0x721   :  { %v1146_v20 = vpop.permute.xlu0 %1145  ;;  %v1186_v21 = vpop.permute.xlu1 %1185 }
 0x722   :  { %v1184_v22 = vmax.f32 %v1183_v19, %v1174_v13  ;;  %v1157_v25 = vmax.f32 %v1156_v5, %v1146_v20  ;;  %v1148_v29 = vmax.f32 %v1144_v4, %v1146_v20  ;;  %v83_v4 = vld [vmem:[#allocation6 + $0x35] ss:$0 sm:$0xff]  ;;  %v84_v13 = vld [vmem:[#allocation6 + $0x36] ss:$0 sm:$0xff] }
 0x724   :  { %v1188_v26 = vmax.f32 %v1184_v22, %v1186_v21 }
 0x725   :  { %v1150_v28 = vpop.permute.xlu1 %1149  ;;  %v1160_v30 = vpop.permute.xlu0 %1159 }
 0x726   :  { %v1909_v31 = vpack.i.bf16 %v1188_v26, %v1176_v24  ;;  %v1158_v32 = vmax.f32 %v1157_v25, %v1150_v28  ;;  %v1152_v33 = vmax.f32 %v1148_v29, %v1150_v28 }
 0x728   :  { %v1162_v34 = vmax.f32 %v1158_v32, %v1160_v30  ;;  %1910 = vrot.lane.b32.xlu1 %v1909_v31, %s2059_s6 }
 0x729   :  { %v1199_v43 = vpop.permute.xlu0 %1198 }
 0x72a   :  { %v1201_v36 = vsel %vm642_vm5, %v1152_v33, %v1162_v34 }
 0x79a   :  { %v1911_v39 = vpop.permute.xlu1 %1910 }
 0x79b   :  { %v1913_v41 = vunpack.i.h.bf16 %v1911_v39  ;;  %v1912_v42 = vunpack.i.l.bf16 %v1911_v39 }
 0x79d   :  { %v1202_v44 = vsel %vm646_vm7, %v1201_v36, %v1912_v42 }
 0x79e   :  { %v1203_v45 = vsel %vm650_vm9, %v1202_v44, %v1913_v41 }
 0x79f   :  { %v1204_v46 = vsel %vm654_vm11, %v1203_v45, %v1199_v43 }
 0x7a0   :  { %v1205_v47 = vpack.c.bf16 %v1204_v46, %v1204_v46 }
 0x7a2   :  { %1677 = vmatmul.mubr.msk.bf16.vlgmr.msra.gmra.mrb[12].mxu1 %vm1242_vm14, %v1205_v47 }
 0x7a3   :  { %1716 = vmatprep.mubr.msk.bf16.mxu1 %vm2062_vm13, %v2048_v49  ;;  %1701 = vmatpush3.bf16.msra.mxu1 %v1947_v53 }
 0x7a4   :  { %1702 = vmatprep.subr.bf16.mxu1 %v2048_v49 }
 0x7a7   :  { %1703 = vmatpush3.bf16.msra.mxu1 %v1948_v55 }
 0x7a8   :  { %1704 = vmatprep.subr.bf16.mxu1 %v2048_v49 }
 0x7ab   :  { %1705 = vmatpush3.bf16.msra.mxu1 %v1949_v56 }
 0x7ac   :  { %1706 = vmatprep.subr.bf16.mxu1 %v2048_v49 }
 0x7af   :  { %1707 = vmatpush3.bf16.msra.mxu1 %v1950_v54 }
 0x7b0   :  { %1708 = vmatprep.subr.bf16.mxu1 %v2048_v49 }
 0x7b3   :  { %1709 = vmatpush3.bf16.msra.mxu1 %v1951_v58 }
 0x7b4   :  { %1710 = vmatprep.subr.bf16.mxu1 %v2048_v49 }
 0x7b7   :  { %1711 = vmatpush3.bf16.msra.mxu1 %v1952_v1 }
 0x7b8   :  { %1712 = vmatprep.subr.bf16.mxu1 %v2048_v49 }
 0x7bb   :  { %1713 = vmatpush3.bf16.msra.mxu1 %v1953_v2 }
 0x7bc   :  { %1714 = vmatprep.subr.bf16.mxu1 %v2048_v49 }
 0x7bf   :  { %1715 = vmatpush3.bf16.msra.mxu1 %v1954_v3 }
 0x875   :  { %v1284_v59 = vpop.f32.mrb[12].mxu1 }
 0x876   :  { %v1285_v60 = vadd.f32 %v1284_v59, %v82_v57  ;;  %v1678_v61 = vpop.f32.mrb[13].mxu1 }
 0x877   :  { %v1287_v62 = vpop.f32.mrb[14].mxu1 }
 0x878   :  { %1959 = vtanh.f32 %v1285_v60  ;;  %v1679_v63 = vpop.f32.mrb[15].mxu1 }
 0x882   :  { %v1960_v51 = vpop.eup %1959 }
 0x883   :  { %v1291_v40 = vpack.c.bf16 %v1960_v51, %v1960_v51 }
 0x885   :  { %1697 = vmatmul.mubr.bf16.vlgmr.msra.gmra.mrb[16].mxu0 %v1291_v40 }
 0x958   :  { %v1390_v5 = vpop.f32.mrb[16].mxu0 }
 0x959   :  { %v1391_v6 = vadd.f32 %v1390_v5, %v83_v4  ;;  %v1698_v7 = vpop.f32.mrb[17].mxu0 }
 0x95a   :  { %v1393_v8 = vpop.f32.mrb[18].mxu0 }
 0x95b   :  { %1961 = vtanh.f32 %v1391_v6  ;;  %v1699_v9 = vpop.f32.mrb[19].mxu0 }
 0x965   :  { %v1962_v10 = vpop.eup %1961 }
 0x966   :  { %v1397_v11 = vpack.c.bf16 %v1962_v10, %v1962_v10 }
 0x968   :  { %1717 = vmatmul.mubr.bf16.vlgmr.msra.gmra.mrb[16].mxu1 %v1397_v11 }
 0xa3b   :  { %v1496_v14 = vpop.f32.mrb[16].mxu1 }
 0xa3c   :  { %v1497_v49 = vadd.f32 %v1496_v14, %v84_v13  ;;  %v1718_v15 = vpop.f32.mrb[17].mxu1 }
 0xa3d   :  { %v1499_v16 = vpop.f32.mrb[18].mxu1 }
 0xa3e   :  { %v1518_v17 = vsel %vm1517_vm15, %v1497_v49, 0.0  ;;  %v1719_v18 = vpop.f32.mrb[19].mxu1  ;;  %v1505_v19 = vsel %vm1504_vm0, %v1497_v49, -inf }
 0xa3f   :  { %v1506_v20 = vsel %vm374_vm4, %v1505_v19, -inf }
 0xa40   :  { %1507 = vmax.xlane.f32.xlu1 %v1506_v20 }
 0xacd   :  { %v1508_v21 = vpop.xlane.xlu1 %1507 }
 0xace   :  { %v1509_v22 = vsub.f32 %v1505_v19, %v1508_v21 }
 0xad0   :  { %v1510_v23 = vmul.f32 1.442695, %v1509_v22 }
 0xad2   :  { %1963 = vpow2.f32 %v1510_v23 }
 0xadc   :  { %v1964_v24 = vpop.eup %1963 }
 0xadd   :  { %v1512_v38 = vsel %vm374_vm4, %v1964_v24, 0.0 }
 0xade   :  { %1513 = vadd.xlane.f32.xlu0 %v1512_v38 }
 0xb6b   :  { %v1514_v25 = vpop.xlane.xlu0 %1513 }
 0xb6c   :  { %1965 = vrcp.f32 %v1514_v25 }
 0xb76   :  { %v1966_v26 = vpop.eup %1965 }
 0xb77   :  { %v1516_v27 = vmul.f32 %v1966_v26, %v1964_v24 }
 0xb79   :  { %v1519_v28 = vadd.f32 %v1518_v17, %v1516_v27 }
 0xb7b   :  { %1520 = vst.msk [vmem:[%s2554_s8] sm:$0xff] %vm374_vm4, %v1519_v28 }
 0xb7c   :  { %1525 = vsyncpa [#allocation3], 1 }
 0xb7d   :  { %1526 = vsyncpa [#allocation5], 1 }

</bundles_post_ra>
